<compile_context>
chip_gen: v7x
topology: tpu7x:2x2x1
jax: 0.10.0
libtpu: 0.0.40
codegen_flags: <defaults>
</compile_context>

<pallas_src>
import jax
import jax.numpy as jnp
from jax import lax
from jax.experimental import pallas as pl
from jax.experimental.pallas import tpu as pltpu


def _round_up(v, m):
    return (v + m - 1) // m * m


@jax.jit
def session_encoder_forward(x, h_0, w_ih, w_hh, b_ih, b_hh):
    """Equivalent of SessionEncoder.forward.

    x    : (B, T, I)  batch_first input
    h_0  : (1, B, H) or None
    w_ih : (3H, I)    torch weight_ih_l0 (gate order r, z, n)
    w_hh : (3H, H)    torch weight_hh_l0
    b_ih : (3H,)
    b_hh : (3H,)
    returns h_n : (B, 1, H)
    """
    B, T, I = x.shape
    H = w_hh.shape[1]
    x_bytes = jnp.dtype(x.dtype).itemsize
    p_bytes = jnp.dtype(w_ih.dtype).itemsize

    if h_0 is None:
        h0 = jnp.zeros((B, H), dtype=x.dtype)
    else:
        h0 = h_0.reshape(B, H).astype(x.dtype)

    if T == 0:  # empty sequence: h_n == h_0
        return h0.reshape(B, 1, H)

    # ---- Static tiling decisions -------------------------------------------------
    # Per-gate hidden size padded to a 128-lane multiple (no-op for H % 128 == 0).
    Hp = _round_up(H, 128)
    # Batch rows padded so sub-32-bit dtypes fill whole packed vregs.
    row_align = 16 if x.dtype == jnp.bfloat16 else 8
    # Batch tile: one tile for small batches; split for large ones (v7x megacore).
    Bt = min(_round_up(max(B, 1), row_align), 128)
    Bp = _round_up(max(B, 1), Bt)
    nbt = Bp // Bt
    # Time chunk: bound per-chunk VMEM (x chunk double-buffered + f32 GI scratch).
    per_step_vmem = Bt * (2 * I * x_bytes + 3 * Hp * 4)
    TC_BUDGET = 6 * 1024 * 1024
    Tc = max(1, min(T, TC_BUDGET // max(per_step_vmem, 1)))
    Tc = min(Tc, 512)
    ntc = pl.cdiv(T, Tc)
    Tpad = ntc * Tc
    needs_mask = Tpad != T
    unroll = True if Tc <= 8 else 8

    # ---- Host-side parameter fusion (tiny, one-time) -----------------------------
    pad_h = Hp - H
    w_ir, w_iz, w_in = jnp.split(w_ih, 3, axis=0)   # each (H, I)
    w_hr, w_hz, w_hn = jnp.split(w_hh, 3, axis=0)   # each (H, H)
    b_ir, b_iz, b_in = jnp.split(b_ih, 3)
    b_hr, b_hz, b_hn = jnp.split(b_hh, 3)

    def pad_cols(w):          # (X, H) -> (X, Hp)
        return jnp.pad(w, ((0, 0), (0, pad_h))) if pad_h else w

    def pad_rows_cols(w):     # (H, H) -> (Hp, Hp)
        return jnp.pad(w, ((0, pad_h), (0, pad_h))) if pad_h else w

    def pad_vec(v):           # (H,) -> (Hp,)
        return jnp.pad(v, (0, pad_h)) if pad_h else v

    wih_f = jnp.concatenate([pad_cols(w_ir.T), pad_cols(w_iz.T), pad_cols(w_in.T)],
                            axis=1)                                    # (I, 3Hp)
    whh_f = jnp.concatenate([pad_rows_cols(w_hr.T), pad_rows_cols(w_hz.T),
                             pad_rows_cols(w_hn.T)], axis=1)           # (Hp, 3Hp)
    bih_f = jnp.concatenate([pad_vec(b_ir + b_hr), pad_vec(b_iz + b_hz),
                             pad_vec(b_in)]).reshape(1, 3 * Hp)        # b_hn stays separate
    bhn_f = pad_vec(b_hn).reshape(1, Hp)

    # ---- Input / h0 layout -------------------------------------------------------
    # TODO(synk): fetch x directly from its (B, T, I) layout via a strided index_map /
    # in-kernel relayout to drop this host-side transpose+pad copy of x.
    x_tm = jnp.transpose(x, (1, 0, 2))                                 # (T, B, I) time-major
    x_tm = jnp.pad(x_tm, ((0, Tpad - T), (0, Bp - B), (0, 0)))         # (Tpad, Bp, I)
    h0p = jnp.pad(h0, ((0, Bp - B), (0, Hp - H)))                      # (Bp, Hp)

    # ---- VMEM budget for the compiler ---------------------------------------------
    vmem_need = (
        2 * Tc * Bt * I * x_bytes            # x chunk, double-buffered
        + Tc * Bt * 3 * Hp * 4               # GI scratch (f32)
        + Bt * Hp * 4                        # h carry scratch (f32)
        + 2 * Bt * Hp * x_bytes              # h0 block
        + 2 * Bt * Hp * x_bytes              # out block
        + 2 * (I + Hp + 2) * 3 * Hp * p_bytes  # fused weights + biases
    )
    vmem_limit = int(min(64 * 1024 * 1024,
                         max(2 * vmem_need + (4 << 20), 32 * 1024 * 1024)))

    # ---- Kernel -------------------------------------------------------------------
    def gru_kernel(x_ref, h0_ref, wih_ref, whh_ref, bih_ref, bhn_ref,
                   out_ref, gi_ref, h_ref):
        tci = pl.program_id(1)
        n_tc = pl.num_programs(1)

        # Input projections for every timestep in this chunk: one MXU matmul in the
        # operands' native dtype (bf16 stays bf16), f32 accumulate, biases folded in.
        x_blk = x_ref[...].reshape(Tc * Bt, I)                         # time-major rows
        gi_ref[...] = (
            jnp.dot(x_blk, wih_ref[...], preferred_element_type=jnp.float32)
            + bih_ref[...].astype(jnp.float32)
        )

        # Initialize the carried hidden state on the first time chunk.
        @pl.when(tci == 0)
        def _init():
            h_ref[...] = h0_ref[...].astype(jnp.float32)

        # Loop invariants hoisted (JAX does not CSE broadcasts inside the loop).
        whh = whh_ref[...]                                             # native dtype
        cast_h = whh.dtype != jnp.float32
        bhn = jnp.broadcast_to(bhn_ref[...].astype(jnp.float32), (Bt, Hp))

        # TODO(synk): keep whh weight-stationary across the T-step loop via
        # pltpu.matmul_push_rhs / matmul_acc_lhs / matmul_pop to avoid per-step RHS
        # streaming on the latency-critical chain.
        def step(i, h):
            start = pl.multiple_of(i * Bt, 8)
            gi = gi_ref[pl.ds(start, Bt), :]                           # (Bt, 3Hp), lane-aligned
            lhs = h.astype(whh.dtype) if cast_h else h
            gh = jnp.dot(lhs, whh, preferred_element_type=jnp.float32)  # (Bt, 3Hp)
            rz = jax.nn.sigmoid(gi[:, : 2 * Hp] + gh[:, : 2 * Hp])     # fused r|z
            r = rz[:, :Hp]
            z = rz[:, Hp:]
            n = jnp.tanh(gi[:, 2 * Hp:] + r * (gh[:, 2 * Hp:] + bhn))
            h_new = n + z * (h - n)                                    # == (1-z)*n + z*h
            if needs_mask:
                h_new = jnp.where(tci * Tc + i < T, h_new, h)          # skip T-pad steps
            return h_new

        h_ref[...] = lax.fori_loop(0, Tc, step, h_ref[...], unroll=unroll)

        # Emit h_n after the last time chunk.
        @pl.when(tci == n_tc - 1)
        def _finish():
            out_ref[...] = h_ref[...].astype(out_ref.dtype)

    h_n = pl.pallas_call(
        gru_kernel,
        out_shape=jax.ShapeDtypeStruct((Bp, Hp), x.dtype),
        grid=(nbt, ntc),
        in_specs=[
            pl.BlockSpec((Tc, Bt, I), lambda b, t: (t, b, 0)),      # x chunk
            pl.BlockSpec((Bt, Hp), lambda b, t: (b, 0)),            # h0
            pl.BlockSpec((I, 3 * Hp), lambda b, t: (0, 0)),         # fused W_ih
            pl.BlockSpec((Hp, 3 * Hp), lambda b, t: (0, 0)),        # fused W_hh
            pl.BlockSpec((1, 3 * Hp), lambda b, t: (0, 0)),         # fused b_ih(+b_hr,b_hz)
            pl.BlockSpec((1, Hp), lambda b, t: (0, 0)),             # b_hn
        ],
        out_specs=pl.BlockSpec((Bt, Hp), lambda b, t: (b, 0)),
        scratch_shapes=[
            pltpu.VMEM((Tc * Bt, 3 * Hp), jnp.float32),             # GI for this chunk
            pltpu.VMEM((Bt, Hp), jnp.float32),                      # carried hidden state
        ],
        compiler_params=pltpu.CompilerParams(
            dimension_semantics=("parallel", "arbitrary"),
            vmem_limit_bytes=vmem_limit,
        ),
    )(x_tm, h0p, wih_f, whh_f, bih_f, bhn_f)

    return h_n[:B, :H].reshape(B, 1, H)


def _gru_reference(x, h_0, w_ih, w_hh, b_ih, b_hh):
    """Pure-JAX reference matching torch.nn.GRU semantics."""
    B, T, I = x.shape
    H = w_hh.shape[1]
    h = (jnp.zeros((B, H), x.dtype) if h_0 is None else h_0.reshape(B, H)).astype(jnp.float32)
    w_ir, w_iz, w_in = jnp.split(w_ih, 3, axis=0)
    w_hr, w_hz, w_hn = jnp.split(w_hh, 3, axis=0)
    b_ir, b_iz, b_in = jnp.split(b_ih, 3)
    b_hr, b_hz, b_hn = jnp.split(b_hh, 3)
    for t in range(T):
        xt = x[:, t, :].astype(jnp.float32)
        r = jax.nn.sigmoid(xt @ w_ir.T + b_ir + h @ w_hr.T + b_hr)
        z = jax.nn.sigmoid(xt @ w_iz.T + b_iz + h @ w_hz.T + b_hz)
        n = jnp.tanh(xt @ w_in.T + b_in + r * (h @ w_hn.T + b_hn))
        h = (1.0 - z) * n + z * h
    return h.reshape(B, 1, H).astype(x.dtype)


if __name__ == "__main__":
    # Small shapes consistent with the module: batch=2, seq=8, inp_size=32, hid_size=32.
    B, T, I, H = 2, 8, 32, 32
    key = jax.random.PRNGKey(0)
    kx, kh, k1, k2, k3, k4 = jax.random.split(key, 6)

    x = jax.random.normal(kx, (B, T, I), dtype=jnp.float32)
    h_0 = jax.random.normal(kh, (1, B, H), dtype=jnp.float32)

    # Deterministic parameter init, PyTorch-style uniform(-1/sqrt(H), 1/sqrt(H)).
    bound = 1.0 / float(H) ** 0.5
    w_ih = jax.random.uniform(k1, (3 * H, I), jnp.float32, -bound, bound)
    w_hh = jax.random.uniform(k2, (3 * H, H), jnp.float32, -bound, bound)
    b_ih = jax.random.uniform(k3, (3 * H,), jnp.float32, -bound, bound)
    b_hh = jax.random.uniform(k4, (3 * H,), jnp.float32, -bound, bound)

    # With explicit h_0.
    h_n = jax.block_until_ready(session_encoder_forward(x, h_0, w_ih, w_hh, b_ih, b_hh))
    ref = _gru_reference(x, h_0, w_ih, w_hh, b_ih, b_hh)
    assert h_n.shape == (B, 1, H)
    assert jnp.allclose(h_n, ref, atol=1e-4, rtol=1e-4), "mismatch vs reference GRU (h_0)"

    # With h_0 = None (zero-init path, like the PyTorch module).
    h_n0 = jax.block_until_ready(session_encoder_forward(x, None, w_ih, w_hh, b_ih, b_hh))
    ref0 = _gru_reference(x, None, w_ih, w_hh, b_ih, b_hh)
    assert jnp.allclose(h_n0, ref0, atol=1e-4, rtol=1e-4), "mismatch vs reference GRU (None)"

    print("KERNEL_OK")
</pallas_src>

<mosaic_0001>
module attributes {stable_mosaic.version = 11 : i64} {
  func.func @gru_kernel(%arg0: i32, %arg1: i32, %arg2: memref<8x8x32xf32, #tpu.memory_space<vmem>>, %arg3: memref<8x128xf32, #tpu.memory_space<vmem>>, %arg4: memref<32x384xf32, #tpu.memory_space<vmem>>, %arg5: memref<128x384xf32, #tpu.memory_space<vmem>>, %arg6: memref<1x384xf32, #tpu.memory_space<vmem>>, %arg7: memref<1x128xf32, #tpu.memory_space<vmem>>, %arg8: memref<8x128xf32, #tpu.memory_space<vmem>>, %arg9: memref<64x384xf32, #tpu.memory_space<vmem>>, %arg10: memref<8x128xf32, #tpu.memory_space<vmem>>) attributes {dimension_semantics = [#tpu.dimension_semantics<parallel>, #tpu.dimension_semantics<arbitrary>], iteration_bounds = array<i64: 1, 1>, scalar_prefetch = 0 : i64, scratch_operands = 2 : i64, tpu.core_type = #tpu.core_type<tc>, window_params = [{transform_indices = @transform_0, window_bounds = array<i64: 8, 8, 32>}, {transform_indices = @transform_1, window_bounds = array<i64: 8, 128>}, {pipeline_mode = #tpu.pipeline_mode<synchronous>, transform_indices = @transform_2, window_bounds = array<i64: 32, 384>}, {pipeline_mode = #tpu.pipeline_mode<synchronous>, transform_indices = @transform_3, window_bounds = array<i64: 128, 384>}, {pipeline_mode = #tpu.pipeline_mode<synchronous>, transform_indices = @transform_4, window_bounds = array<i64: 1, 384>}, {pipeline_mode = #tpu.pipeline_mode<synchronous>, transform_indices = @transform_5, window_bounds = array<i64: 1, 128>}, {transform_indices = @transform_6, window_bounds = array<i64: 8, 128>}]} {
    %c0 = arith.constant 0 : index
    %c0_0 = arith.constant 0 : index
    %c0_1 = arith.constant 0 : index
    %0 = vector.load %arg2[%c0, %c0_0, %c0_1] : memref<8x8x32xf32, #tpu.memory_space<vmem>>, vector<8x8x32xf32>
    %1 = vector.shape_cast %0 : vector<8x8x32xf32> to vector<64x32xf32>
    %c0_2 = arith.constant 0 : index
    %c0_3 = arith.constant 0 : index
    %2 = vector.load %arg4[%c0_2, %c0_3] : memref<32x384xf32, #tpu.memory_space<vmem>>, vector<32x384xf32>
    %cst = arith.constant dense<0.000000e+00> : vector<64x384xf32>
    %3 = tpu.matmul %1, %2, %cst {dimension_numbers = #tpu.dot_dimension_numbers<[1], [0], [0], [1], [0, 0, 1, 1], [], []>} : vector<64x32xf32>, vector<32x384xf32>, vector<64x384xf32> -> vector<64x384xf32>
    %c0_4 = arith.constant 0 : index
    %c0_5 = arith.constant 0 : index
    %4 = vector.load %arg6[%c0_4, %c0_5] : memref<1x384xf32, #tpu.memory_space<vmem>>, vector<1x384xf32>
    %5 = vector.broadcast %4 : vector<1x384xf32> to vector<64x384xf32>
    %6 = arith.addf %3, %5 : vector<64x384xf32>
    %c0_6 = arith.constant 0 : index
    %c0_7 = arith.constant 0 : index
    %7 = vector.load %arg9[%c0_6, %c0_7] : memref<64x384xf32, #tpu.memory_space<vmem>>, vector<64x384xf32>
    tpu.vector_store %arg9[%c0_6, %c0_7], %6 {strides = array<i32>} : memref<64x384xf32, #tpu.memory_space<vmem>>, vector<64x384xf32>,
    %c0_i32 = arith.constant 0 : i32
    %8 = arith.cmpi eq, %arg1, %c0_i32 : i32
    %9 = arith.extui %8 : i1 to i32
    %c0_i32_8 = arith.constant 0 : i32
    %10 = arith.cmpi ne, %9, %c0_i32_8 : i32
    scf.if %10 {
      %c0_52 = arith.constant 0 : index
      %c0_53 = arith.constant 0 : index
      %212 = vector.load %arg3[%c0_52, %c0_53] : memref<8x128xf32, #tpu.memory_space<vmem>>, vector<8x128xf32>
      %c0_54 = arith.constant 0 : index
      %c0_55 = arith.constant 0 : index
      %213 = vector.load %arg10[%c0_54, %c0_55] : memref<8x128xf32, #tpu.memory_space<vmem>>, vector<8x128xf32>
      tpu.vector_store %arg10[%c0_54, %c0_55], %212 {strides = array<i32>} : memref<8x128xf32, #tpu.memory_space<vmem>>, vector<8x128xf32>,
    } else {
    }
    %c0_9 = arith.constant 0 : index
    %c0_10 = arith.constant 0 : index
    %11 = vector.load %arg5[%c0_9, %c0_10] : memref<128x384xf32, #tpu.memory_space<vmem>>, vector<128x384xf32>
    %c0_11 = arith.constant 0 : index
    %c0_12 = arith.constant 0 : index
    %12 = vector.load %arg7[%c0_11, %c0_12] : memref<1x128xf32, #tpu.memory_space<vmem>>, vector<1x128xf32>
    %13 = vector.shape_cast %12 : vector<1x128xf32> to vector<1x128xf32>
    %14 = vector.broadcast %13 : vector<1x128xf32> to vector<8x128xf32>
    %c0_13 = arith.constant 0 : index
    %c0_14 = arith.constant 0 : index
    %15 = vector.load %arg10[%c0_13, %c0_14] : memref<8x128xf32, #tpu.memory_space<vmem>>, vector<8x128xf32>
    %c0_i32_15 = arith.constant 0 : i32
    %c8_i32 = arith.constant 8 : i32
    %16 = arith.muli %c0_i32_15, %c8_i32 : i32
    %17 = tpu.assume_multiple %16, 8 : i32
    %18 = arith.index_cast %17 : i32 to index
    %c0_16 = arith.constant 0 : index
    %19 = vector.load %arg9[%18, %c0_16] : memref<64x384xf32, #tpu.memory_space<vmem>>, vector<8x384xf32>
    %cst_17 = arith.constant dense<0.000000e+00> : vector<8x384xf32>
    %20 = tpu.matmul %15, %11, %cst_17 {dimension_numbers = #tpu.dot_dimension_numbers<[1], [0], [0], [1], [0, 0, 1, 1], [], []>} : vector<8x128xf32>, vector<128x384xf32>, vector<8x384xf32> -> vector<8x384xf32>
    %21 = vector.extract_strided_slice %19 {offsets = [0, 0], sizes = [8, 256], strides = [1, 1]} : vector<8x384xf32> to vector<8x256xf32>
    %22 = vector.extract_strided_slice %20 {offsets = [0, 0], sizes = [8, 256], strides = [1, 1]} : vector<8x384xf32> to vector<8x256xf32>
    %23 = arith.addf %21, %22 : vector<8x256xf32>
    %24 = arith.negf %23 : vector<8x256xf32>
    %25 = math.exp %24 : vector<8x256xf32>
    %cst_18 = arith.constant 1.000000e+00 : f32
    %26 = vector.broadcast %cst_18 : f32 to vector<8x256xf32>
    %27 = arith.addf %26, %25 : vector<8x256xf32>
    %28 = arith.divf %26, %27 : vector<8x256xf32>
    %29 = vector.extract_strided_slice %28 {offsets = [0, 0], sizes = [8, 128], strides = [1, 1]} : vector<8x256xf32> to vector<8x128xf32>
    %30 = vector.extract_strided_slice %28 {offsets = [0, 128], sizes = [8, 128], strides = [1, 1]} : vector<8x256xf32> to vector<8x128xf32>
    %31 = vector.extract_strided_slice %19 {offsets = [0, 256], sizes = [8, 128], strides = [1, 1]} : vector<8x384xf32> to vector<8x128xf32>
    %32 = vector.extract_strided_slice %20 {offsets = [0, 256], sizes = [8, 128], strides = [1, 1]} : vector<8x384xf32> to vector<8x128xf32>
    %33 = arith.addf %32, %14 : vector<8x128xf32>
    %34 = arith.mulf %29, %33 : vector<8x128xf32>
    %35 = arith.addf %31, %34 : vector<8x128xf32>
    %36 = math.tanh %35 : vector<8x128xf32>
    %37 = arith.subf %15, %36 : vector<8x128xf32>
    %38 = arith.mulf %30, %37 : vector<8x128xf32>
    %39 = arith.addf %36, %38 : vector<8x128xf32>
    %c1_i32 = arith.constant 1 : i32
    %c8_i32_19 = arith.constant 8 : i32
    %40 = arith.muli %c1_i32, %c8_i32_19 : i32
    %41 = tpu.assume_multiple %40, 8 : i32
    %42 = arith.index_cast %41 : i32 to index
    %c0_20 = arith.constant 0 : index
    %43 = vector.load %arg9[%42, %c0_20] : memref<64x384xf32, #tpu.memory_space<vmem>>, vector<8x384xf32>
    %cst_21 = arith.constant dense<0.000000e+00> : vector<8x384xf32>
    %44 = tpu.matmul %39, %11, %cst_21 {dimension_numbers = #tpu.dot_dimension_numbers<[1], [0], [0], [1], [0, 0, 1, 1], [], []>} : vector<8x128xf32>, vector<128x384xf32>, vector<8x384xf32> -> vector<8x384xf32>
    %45 = vector.extract_strided_slice %43 {offsets = [0, 0], sizes = [8, 256], strides = [1, 1]} : vector<8x384xf32> to vector<8x256xf32>
    %46 = vector.extract_strided_slice %44 {offsets = [0, 0], sizes = [8, 256], strides = [1, 1]} : vector<8x384xf32> to vector<8x256xf32>
    %47 = arith.addf %45, %46 : vector<8x256xf32>
    %48 = arith.negf %47 : vector<8x256xf32>
    %49 = math.exp %48 : vector<8x256xf32>
    %cst_22 = arith.constant 1.000000e+00 : f32
    %50 = vector.broadcast %cst_22 : f32 to vector<8x256xf32>
    %51 = arith.addf %50, %49 : vector<8x256xf32>
    %52 = arith.divf %50, %51 : vector<8x256xf32>
    %53 = vector.extract_strided_slice %52 {offsets = [0, 0], sizes = [8, 128], strides = [1, 1]} : vector<8x256xf32> to vector<8x128xf32>
    %54 = vector.extract_strided_slice %52 {offsets = [0, 128], sizes = [8, 128], strides = [1, 1]} : vector<8x256xf32> to vector<8x128xf32>
    %55 = vector.extract_strided_slice %43 {offsets = [0, 256], sizes = [8, 128], strides = [1, 1]} : vector<8x384xf32> to vector<8x128xf32>
    %56 = vector.extract_strided_slice %44 {offsets = [0, 256], sizes = [8, 128], strides = [1, 1]} : vector<8x384xf32> to vector<8x128xf32>
    %57 = arith.addf %56, %14 : vector<8x128xf32>
    %58 = arith.mulf %53, %57 : vector<8x128xf32>
    %59 = arith.addf %55, %58 : vector<8x128xf32>
    %60 = math.tanh %59 : vector<8x128xf32>
    %61 = arith.subf %39, %60 : vector<8x128xf32>
    %62 = arith.mulf %54, %61 : vector<8x128xf32>
    %63 = arith.addf %60, %62 : vector<8x128xf32>
    %c2_i32 = arith.constant 2 : i32
    %c8_i32_23 = arith.constant 8 : i32
    %64 = arith.muli %c2_i32, %c8_i32_23 : i32
    %65 = tpu.assume_multiple %64, 8 : i32
    %66 = arith.index_cast %65 : i32 to index
    %c0_24 = arith.constant 0 : index
    %67 = vector.load %arg9[%66, %c0_24] : memref<64x384xf32, #tpu.memory_space<vmem>>, vector<8x384xf32>
    %cst_25 = arith.constant dense<0.000000e+00> : vector<8x384xf32>
    %68 = tpu.matmul %63, %11, %cst_25 {dimension_numbers = #tpu.dot_dimension_numbers<[1], [0], [0], [1], [0, 0, 1, 1], [], []>} : vector<8x128xf32>, vector<128x384xf32>, vector<8x384xf32> -> vector<8x384xf32>
    %69 = vector.extract_strided_slice %67 {offsets = [0, 0], sizes = [8, 256], strides = [1, 1]} : vector<8x384xf32> to vector<8x256xf32>
    %70 = vector.extract_strided_slice %68 {offsets = [0, 0], sizes = [8, 256], strides = [1, 1]} : vector<8x384xf32> to vector<8x256xf32>
    %71 = arith.addf %69, %70 : vector<8x256xf32>
    %72 = arith.negf %71 : vector<8x256xf32>
    %73 = math.exp %72 : vector<8x256xf32>
    %cst_26 = arith.constant 1.000000e+00 : f32
    %74 = vector.broadcast %cst_26 : f32 to vector<8x256xf32>
    %75 = arith.addf %74, %73 : vector<8x256xf32>
    %76 = arith.divf %74, %75 : vector<8x256xf32>
    %77 = vector.extract_strided_slice %76 {offsets = [0, 0], sizes = [8, 128], strides = [1, 1]} : vector<8x256xf32> to vector<8x128xf32>
    %78 = vector.extract_strided_slice %76 {offsets = [0, 128], sizes = [8, 128], strides = [1, 1]} : vector<8x256xf32> to vector<8x128xf32>
    %79 = vector.extract_strided_slice %67 {offsets = [0, 256], sizes = [8, 128], strides = [1, 1]} : vector<8x384xf32> to vector<8x128xf32>
    %80 = vector.extract_strided_slice %68 {offsets = [0, 256], sizes = [8, 128], strides = [1, 1]} : vector<8x384xf32> to vector<8x128xf32>
    %81 = arith.addf %80, %14 : vector<8x128xf32>
    %82 = arith.mulf %77, %81 : vector<8x128xf32>
    %83 = arith.addf %79, %82 : vector<8x128xf32>
    %84 = math.tanh %83 : vector<8x128xf32>
    %85 = arith.subf %63, %84 : vector<8x128xf32>
    %86 = arith.mulf %78, %85 : vector<8x128xf32>
    %87 = arith.addf %84, %86 : vector<8x128xf32>
    %c3_i32 = arith.constant 3 : i32
    %c8_i32_27 = arith.constant 8 : i32
    %88 = arith.muli %c3_i32, %c8_i32_27 : i32
    %89 = tpu.assume_multiple %88, 8 : i32
    %90 = arith.index_cast %89 : i32 to index
    %c0_28 = arith.constant 0 : index
    %91 = vector.load %arg9[%90, %c0_28] : memref<64x384xf32, #tpu.memory_space<vmem>>, vector<8x384xf32>
    %cst_29 = arith.constant dense<0.000000e+00> : vector<8x384xf32>
    %92 = tpu.matmul %87, %11, %cst_29 {dimension_numbers = #tpu.dot_dimension_numbers<[1], [0], [0], [1], [0, 0, 1, 1], [], []>} : vector<8x128xf32>, vector<128x384xf32>, vector<8x384xf32> -> vector<8x384xf32>
    %93 = vector.extract_strided_slice %91 {offsets = [0, 0], sizes = [8, 256], strides = [1, 1]} : vector<8x384xf32> to vector<8x256xf32>
    %94 = vector.extract_strided_slice %92 {offsets = [0, 0], sizes = [8, 256], strides = [1, 1]} : vector<8x384xf32> to vector<8x256xf32>
    %95 = arith.addf %93, %94 : vector<8x256xf32>
    %96 = arith.negf %95 : vector<8x256xf32>
    %97 = math.exp %96 : vector<8x256xf32>
    %cst_30 = arith.constant 1.000000e+00 : f32
    %98 = vector.broadcast %cst_30 : f32 to vector<8x256xf32>
    %99 = arith.addf %98, %97 : vector<8x256xf32>
    %100 = arith.divf %98, %99 : vector<8x256xf32>
    %101 = vector.extract_strided_slice %100 {offsets = [0, 0], sizes = [8, 128], strides = [1, 1]} : vector<8x256xf32> to vector<8x128xf32>
    %102 = vector.extract_strided_slice %100 {offsets = [0, 128], sizes = [8, 128], strides = [1, 1]} : vector<8x256xf32> to vector<8x128xf32>
    %103 = vector.extract_strided_slice %91 {offsets = [0, 256], sizes = [8, 128], strides = [1, 1]} : vector<8x384xf32> to vector<8x128xf32>
    %104 = vector.extract_strided_slice %92 {offsets = [0, 256], sizes = [8, 128], strides = [1, 1]} : vector<8x384xf32> to vector<8x128xf32>
    %105 = arith.addf %104, %14 : vector<8x128xf32>
    %106 = arith.mulf %101, %105 : vector<8x128xf32>
    %107 = arith.addf %103, %106 : vector<8x128xf32>
    %108 = math.tanh %107 : vector<8x128xf32>
    %109 = arith.subf %87, %108 : vector<8x128xf32>
    %110 = arith.mulf %102, %109 : vector<8x128xf32>
    %111 = arith.addf %108, %110 : vector<8x128xf32>
    %c4_i32 = arith.constant 4 : i32
    %c8_i32_31 = arith.constant 8 : i32
    %112 = arith.muli %c4_i32, %c8_i32_31 : i32
    %113 = tpu.assume_multiple %112, 8 : i32
    %114 = arith.index_cast %113 : i32 to index
    %c0_32 = arith.constant 0 : index
    %115 = vector.load %arg9[%114, %c0_32] : memref<64x384xf32, #tpu.memory_space<vmem>>, vector<8x384xf32>
    %cst_33 = arith.constant dense<0.000000e+00> : vector<8x384xf32>
    %116 = tpu.matmul %111, %11, %cst_33 {dimension_numbers = #tpu.dot_dimension_numbers<[1], [0], [0], [1], [0, 0, 1, 1], [], []>} : vector<8x128xf32>, vector<128x384xf32>, vector<8x384xf32> -> vector<8x384xf32>
    %117 = vector.extract_strided_slice %115 {offsets = [0, 0], sizes = [8, 256], strides = [1, 1]} : vector<8x384xf32> to vector<8x256xf32>
    %118 = vector.extract_strided_slice %116 {offsets = [0, 0], sizes = [8, 256], strides = [1, 1]} : vector<8x384xf32> to vector<8x256xf32>
    %119 = arith.addf %117, %118 : vector<8x256xf32>
    %120 = arith.negf %119 : vector<8x256xf32>
    %121 = math.exp %120 : vector<8x256xf32>
    %cst_34 = arith.constant 1.000000e+00 : f32
    %122 = vector.broadcast %cst_34 : f32 to vector<8x256xf32>
    %123 = arith.addf %122, %121 : vector<8x256xf32>
    %124 = arith.divf %122, %123 : vector<8x256xf32>
    %125 = vector.extract_strided_slice %124 {offsets = [0, 0], sizes = [8, 128], strides = [1, 1]} : vector<8x256xf32> to vector<8x128xf32>
    %126 = vector.extract_strided_slice %124 {offsets = [0, 128], sizes = [8, 128], strides = [1, 1]} : vector<8x256xf32> to vector<8x128xf32>
    %127 = vector.extract_strided_slice %115 {offsets = [0, 256], sizes = [8, 128], strides = [1, 1]} : vector<8x384xf32> to vector<8x128xf32>
    %128 = vector.extract_strided_slice %116 {offsets = [0, 256], sizes = [8, 128], strides = [1, 1]} : vector<8x384xf32> to vector<8x128xf32>
    %129 = arith.addf %128, %14 : vector<8x128xf32>
    %130 = arith.mulf %125, %129 : vector<8x128xf32>
    %131 = arith.addf %127, %130 : vector<8x128xf32>
    %132 = math.tanh %131 : vector<8x128xf32>
    %133 = arith.subf %111, %132 : vector<8x128xf32>
    %134 = arith.mulf %126, %133 : vector<8x128xf32>
    %135 = arith.addf %132, %134 : vector<8x128xf32>
    %c5_i32 = arith.constant 5 : i32
    %c8_i32_35 = arith.constant 8 : i32
    %136 = arith.muli %c5_i32, %c8_i32_35 : i32
    %137 = tpu.assume_multiple %136, 8 : i32
    %138 = arith.index_cast %137 : i32 to index
    %c0_36 = arith.constant 0 : index
    %139 = vector.load %arg9[%138, %c0_36] : memref<64x384xf32, #tpu.memory_space<vmem>>, vector<8x384xf32>
    %cst_37 = arith.constant dense<0.000000e+00> : vector<8x384xf32>
    %140 = tpu.matmul %135, %11, %cst_37 {dimension_numbers = #tpu.dot_dimension_numbers<[1], [0], [0], [1], [0, 0, 1, 1], [], []>} : vector<8x128xf32>, vector<128x384xf32>, vector<8x384xf32> -> vector<8x384xf32>
    %141 = vector.extract_strided_slice %139 {offsets = [0, 0], sizes = [8, 256], strides = [1, 1]} : vector<8x384xf32> to vector<8x256xf32>
    %142 = vector.extract_strided_slice %140 {offsets = [0, 0], sizes = [8, 256], strides = [1, 1]} : vector<8x384xf32> to vector<8x256xf32>
    %143 = arith.addf %141, %142 : vector<8x256xf32>
    %144 = arith.negf %143 : vector<8x256xf32>
    %145 = math.exp %144 : vector<8x256xf32>
    %cst_38 = arith.constant 1.000000e+00 : f32
    %146 = vector.broadcast %cst_38 : f32 to vector<8x256xf32>
    %147 = arith.addf %146, %145 : vector<8x256xf32>
    %148 = arith.divf %146, %147 : vector<8x256xf32>
    %149 = vector.extract_strided_slice %148 {offsets = [0, 0], sizes = [8, 128], strides = [1, 1]} : vector<8x256xf32> to vector<8x128xf32>
    %150 = vector.extract_strided_slice %148 {offsets = [0, 128], sizes = [8, 128], strides = [1, 1]} : vector<8x256xf32> to vector<8x128xf32>
    %151 = vector.extract_strided_slice %139 {offsets = [0, 256], sizes = [8, 128], strides = [1, 1]} : vector<8x384xf32> to vector<8x128xf32>
    %152 = vector.extract_strided_slice %140 {offsets = [0, 256], sizes = [8, 128], strides = [1, 1]} : vector<8x384xf32> to vector<8x128xf32>
    %153 = arith.addf %152, %14 : vector<8x128xf32>
    %154 = arith.mulf %149, %153 : vector<8x128xf32>
    %155 = arith.addf %151, %154 : vector<8x128xf32>
    %156 = math.tanh %155 : vector<8x128xf32>
    %157 = arith.subf %135, %156 : vector<8x128xf32>
    %158 = arith.mulf %150, %157 : vector<8x128xf32>
    %159 = arith.addf %156, %158 : vector<8x128xf32>
    %c6_i32 = arith.constant 6 : i32
    %c8_i32_39 = arith.constant 8 : i32
    %160 = arith.muli %c6_i32, %c8_i32_39 : i32
    %161 = tpu.assume_multiple %160, 8 : i32
    %162 = arith.index_cast %161 : i32 to index
    %c0_40 = arith.constant 0 : index
    %163 = vector.load %arg9[%162, %c0_40] : memref<64x384xf32, #tpu.memory_space<vmem>>, vector<8x384xf32>
    %cst_41 = arith.constant dense<0.000000e+00> : vector<8x384xf32>
    %164 = tpu.matmul %159, %11, %cst_41 {dimension_numbers = #tpu.dot_dimension_numbers<[1], [0], [0], [1], [0, 0, 1, 1], [], []>} : vector<8x128xf32>, vector<128x384xf32>, vector<8x384xf32> -> vector<8x384xf32>
    %165 = vector.extract_strided_slice %163 {offsets = [0, 0], sizes = [8, 256], strides = [1, 1]} : vector<8x384xf32> to vector<8x256xf32>
    %166 = vector.extract_strided_slice %164 {offsets = [0, 0], sizes = [8, 256], strides = [1, 1]} : vector<8x384xf32> to vector<8x256xf32>
    %167 = arith.addf %165, %166 : vector<8x256xf32>
    %168 = arith.negf %167 : vector<8x256xf32>
    %169 = math.exp %168 : vector<8x256xf32>
    %cst_42 = arith.constant 1.000000e+00 : f32
    %170 = vector.broadcast %cst_42 : f32 to vector<8x256xf32>
    %171 = arith.addf %170, %169 : vector<8x256xf32>
    %172 = arith.divf %170, %171 : vector<8x256xf32>
    %173 = vector.extract_strided_slice %172 {offsets = [0, 0], sizes = [8, 128], strides = [1, 1]} : vector<8x256xf32> to vector<8x128xf32>
    %174 = vector.extract_strided_slice %172 {offsets = [0, 128], sizes = [8, 128], strides = [1, 1]} : vector<8x256xf32> to vector<8x128xf32>
    %175 = vector.extract_strided_slice %163 {offsets = [0, 256], sizes = [8, 128], strides = [1, 1]} : vector<8x384xf32> to vector<8x128xf32>
    %176 = vector.extract_strided_slice %164 {offsets = [0, 256], sizes = [8, 128], strides = [1, 1]} : vector<8x384xf32> to vector<8x128xf32>
    %177 = arith.addf %176, %14 : vector<8x128xf32>
    %178 = arith.mulf %173, %177 : vector<8x128xf32>
    %179 = arith.addf %175, %178 : vector<8x128xf32>
    %180 = math.tanh %179 : vector<8x128xf32>
    %181 = arith.subf %159, %180 : vector<8x128xf32>
    %182 = arith.mulf %174, %181 : vector<8x128xf32>
    %183 = arith.addf %180, %182 : vector<8x128xf32>
    %c7_i32 = arith.constant 7 : i32
    %c8_i32_43 = arith.constant 8 : i32
    %184 = arith.muli %c7_i32, %c8_i32_43 : i32
    %185 = tpu.assume_multiple %184, 8 : i32
    %186 = arith.index_cast %185 : i32 to index
    %c0_44 = arith.constant 0 : index
    %187 = vector.load %arg9[%186, %c0_44] : memref<64x384xf32, #tpu.memory_space<vmem>>, vector<8x384xf32>
    %cst_45 = arith.constant dense<0.000000e+00> : vector<8x384xf32>
    %188 = tpu.matmul %183, %11, %cst_45 {dimension_numbers = #tpu.dot_dimension_numbers<[1], [0], [0], [1], [0, 0, 1, 1], [], []>} : vector<8x128xf32>, vector<128x384xf32>, vector<8x384xf32> -> vector<8x384xf32>
    %189 = vector.extract_strided_slice %187 {offsets = [0, 0], sizes = [8, 256], strides = [1, 1]} : vector<8x384xf32> to vector<8x256xf32>
    %190 = vector.extract_strided_slice %188 {offsets = [0, 0], sizes = [8, 256], strides = [1, 1]} : vector<8x384xf32> to vector<8x256xf32>
    %191 = arith.addf %189, %190 : vector<8x256xf32>
    %192 = arith.negf %191 : vector<8x256xf32>
    %193 = math.exp %192 : vector<8x256xf32>
    %cst_46 = arith.constant 1.000000e+00 : f32
    %194 = vector.broadcast %cst_46 : f32 to vector<8x256xf32>
    %195 = arith.addf %194, %193 : vector<8x256xf32>
    %196 = arith.divf %194, %195 : vector<8x256xf32>
    %197 = vector.extract_strided_slice %196 {offsets = [0, 0], sizes = [8, 128], strides = [1, 1]} : vector<8x256xf32> to vector<8x128xf32>
    %198 = vector.extract_strided_slice %196 {offsets = [0, 128], sizes = [8, 128], strides = [1, 1]} : vector<8x256xf32> to vector<8x128xf32>
    %199 = vector.extract_strided_slice %187 {offsets = [0, 256], sizes = [8, 128], strides = [1, 1]} : vector<8x384xf32> to vector<8x128xf32>
    %200 = vector.extract_strided_slice %188 {offsets = [0, 256], sizes = [8, 128], strides = [1, 1]} : vector<8x384xf32> to vector<8x128xf32>
    %201 = arith.addf %200, %14 : vector<8x128xf32>
    %202 = arith.mulf %197, %201 : vector<8x128xf32>
    %203 = arith.addf %199, %202 : vector<8x128xf32>
    %204 = math.tanh %203 : vector<8x128xf32>
    %205 = arith.subf %183, %204 : vector<8x128xf32>
    %206 = arith.mulf %198, %205 : vector<8x128xf32>
    %207 = arith.addf %204, %206 : vector<8x128xf32>
    %c8_i32_47 = arith.constant 8 : i32
    %c0_48 = arith.constant 0 : index
    %c0_49 = arith.constant 0 : index
    %208 = vector.load %arg10[%c0_48, %c0_49] : memref<8x128xf32, #tpu.memory_space<vmem>>, vector<8x128xf32>
    tpu.vector_store %arg10[%c0_48, %c0_49], %207 {strides = array<i32>} : memref<8x128xf32, #tpu.memory_space<vmem>>, vector<8x128xf32>,
    %c0_i32_50 = arith.constant 0 : i32
    %209 = arith.cmpi eq, %arg1, %c0_i32_50 : i32
    %210 = arith.extui %209 : i1 to i32
    %c0_i32_51 = arith.constant 0 : i32
    %211 = arith.cmpi ne, %210, %c0_i32_51 : i32
    scf.if %211 {
      %c0_52 = arith.constant 0 : index
      %c0_53 = arith.constant 0 : index
      %212 = vector.load %arg10[%c0_52, %c0_53] : memref<8x128xf32, #tpu.memory_space<vmem>>, vector<8x128xf32>
      %c0_54 = arith.constant 0 : index
      %c0_55 = arith.constant 0 : index
      %213 = vector.load %arg8[%c0_54, %c0_55] : memref<8x128xf32, #tpu.memory_space<vmem>>, vector<8x128xf32>
      tpu.vector_store %arg8[%c0_54, %c0_55], %212 {strides = array<i32>} : memref<8x128xf32, #tpu.memory_space<vmem>>, vector<8x128xf32>,
    } else {
    }
    return
  }
  func.func @transform_0(%arg0: i32, %arg1: i32) -> (i32, i32, i32) {
    %c0_i32 = arith.constant 0 : i32
    %c0_i32_0 = arith.constant 0 : i32
    return %arg1, %arg0, %c0_i32 : i32, i32, i32
  }
  func.func @transform_1(%arg0: i32, %arg1: i32) -> (i32, i32) {
    %c0_i32 = arith.constant 0 : i32
    %c0_i32_0 = arith.constant 0 : i32
    return %arg0, %c0_i32 : i32, i32
  }
  func.func @transform_2(%arg0: i32, %arg1: i32) -> (i32, i32) {
    %c0_i32 = arith.constant 0 : i32
    %c0_i32_0 = arith.constant 0 : i32
    %c0_i32_1 = arith.constant 0 : i32
    return %c0_i32, %c0_i32_0 : i32, i32
  }
  func.func @transform_3(%arg0: i32, %arg1: i32) -> (i32, i32) {
    %c0_i32 = arith.constant 0 : i32
    %c0_i32_0 = arith.constant 0 : i32
    %c0_i32_1 = arith.constant 0 : i32
    return %c0_i32, %c0_i32_0 : i32, i32
  }
  func.func @transform_4(%arg0: i32, %arg1: i32) -> (i32, i32) {
    %c0_i32 = arith.constant 0 : i32
    %c0_i32_0 = arith.constant 0 : i32
    %c0_i32_1 = arith.constant 0 : i32
    return %c0_i32, %c0_i32_0 : i32, i32
  }
  func.func @transform_5(%arg0: i32, %arg1: i32) -> (i32, i32) {
    %c0_i32 = arith.constant 0 : i32
    %c0_i32_0 = arith.constant 0 : i32
    %c0_i32_1 = arith.constant 0 : i32
    return %c0_i32, %c0_i32_0 : i32, i32
  }
  func.func @transform_6(%arg0: i32, %arg1: i32) -> (i32, i32) {
    %c0_i32 = arith.constant 0 : i32
    %c0_i32_0 = arith.constant 0 : i32
    return %arg0, %c0_i32 : i32, i32
  }
}

</mosaic_0001>

<bundles_post_ra>
// kernel: session_encoder_forward.1
= control target key start
LH: loop header
LB: loop body
LE: loop exit
PB: predicated region body
PF: predicated region fallthrough
CT: control target
= control target key end

     0   :  { %v2810_v3 = vmov 0.0   ;;  %vm60_vm0 = vcmask 261120   ;;  %v2811_v57 = vmov 0.0|0.0   ;;  %vm2812_vm1 = vmmov 0   ;;  %s3472_s2 = inlined_call_operand.vmem [shape: f32[32,384], index: 2, kind: input, shape index: {}]   ;;  %s3473_s0 = inlined_call_operand.vmem [shape: f32[8,8,32], index: 0, kind: input, shape index: {}]   ;;  %s3474_s3 = inlined_call_operand.vmem [shape: f32[128,384], index: 3, kind: input, shape index: {}]   ;;  %s3475_s1 = inlined_call_operand.vmem [shape: f32[8,128], index: 1, kind: input, shape index: {}]   ;;  %s3476_s4 = inlined_call_operand.vmem [shape: f32[1,384], index: 4, kind: input, shape index: {}]   ;;  %s3477_s5 = inlined_call_operand.vmem [shape: f32[1,128], index: 5, kind: input, shape index: {}]   ;;  %s3478_s6 = inlined_call_operand.vmem [shape: f32[8,128], index: 6, kind: output, shape index: {}]  }
   0x1   :  { %v32_v0 = vld [vmem:[%s3472_s2 + $0x8] sm:$0xff]  ;;  %v35_v1 = vld [vmem:[%s3472_s2 + $0x20] sm:$0xff]  ;;  %149 = vmatprep.mubr.f32.mxu0 %v2810_v3  ;;  %v34_v5 = vld [vmem:[%s3472_s2 + $0x18] sm:$0xff] }
   0x2   :  { %v31_v2 = vld [vmem:[%s3472_s2] sm:$0xff]  ;;  %v2231_v4 = vpack.c.bf16 %v35_v1, %v32_v0  ;;  %v38_v6 = vld [vmem:[%s3472_s2 + $0x38] sm:$0xff]  ;;  %v41_v7 = vld [vmem:[%s3472_s2 + $0x50] sm:$0xff] }
   0x3   :  { %v2233_v8 = vpack.c.bf16 %v34_v5, %v31_v2  ;;  %v2235_v9 = vpack.c.bf16 %v41_v7, %v38_v6  ;;  %v37_v10 = vld [vmem:[%s3472_s2 + $0x30] sm:$0xff]  ;;  %v40_v11 = vld [vmem:[%s3472_s2 + $0x48] sm:$0xff]  ;;  %v23_v12 = vld [vmem:[%s3473_s0] sm:$0xff] }
   0x4   :  { %2232 = vmatprep.subr.bf16.mxu0 %v2231_v4  ;;  %v334_v13 = vld [vmem:[%s3474_s3 + $0x8] sm:$0xff]  ;;  %v337_v14 = vld [vmem:[%s3474_s3 + $0x20] sm:$0xff]  ;;  %1939 = vmatprep.mubr.msk.f32.mxu1 %vm60_vm0, %v23_v12  ;;  %v2237_v15 = vpack.c.bf16 %v40_v11, %v37_v10  ;;  %v336_v18 = vld [vmem:[%s3474_s3 + $0x18] sm:$0xff] }
   0x5   :  { %2234 = vmatpush1.bf16.msra.mxu0 %v2233_v8  ;;  %v2883_v16 = vpack.c.bf16 %v337_v14, %v334_v13  ;;  %v333_v17 = vld [vmem:[%s3474_s3] sm:$0xff]  ;;  %v340_v19 = vld [vmem:[%s3474_s3 + $0x38] sm:$0xff]  ;;  %v343_v20 = vld [vmem:[%s3474_s3 + $0x50] sm:$0xff] }
   0x6   :  { %2236 = vmatprep.subr.bf16.mxu0 %v2235_v9  ;;  %v2897_v21 = vpack.c.bf16 %v336_v18, %v333_v17  ;;  %v2900_v22 = vpack.c.bf16 %v343_v20, %v340_v19  ;;  %v339_v23 = vld [vmem:[%s3474_s3 + $0x30] sm:$0xff]  ;;  %v342_v24 = vld [vmem:[%s3474_s3 + $0x48] sm:$0xff]  ;;  %v349_v26 = vld [vmem:[%s3474_s3 + $0x80] sm:$0xff] }
   0x7   :  { %v346_v25 = vld [vmem:[%s3474_s3 + $0x68] sm:$0xff]  ;;  %v33_v27 = vld [vmem:[%s3472_s2 + $0x10] sm:$0xff]  ;;  %v2926_v30 = vpack.c.bf16 %v342_v24, %v339_v23  ;;  %v345_v31 = vld [vmem:[%s3474_s3 + $0x60] sm:$0xff] }
   0x8   :  { %v36_v28 = vld [vmem:[%s3472_s2 + $0x28] sm:$0xff]  ;;  %v2932_v33 = vpack.c.bf16 %v349_v26, %v346_v25  ;;  %v348_v34 = vld [vmem:[%s3474_s3 + $0x78] sm:$0xff]  ;;  %v39_v35 = vld [vmem:[%s3472_s2 + $0x40] sm:$0xff] }
   0x9   :  { %2238 = vmatpush1.bf16.msra.mxu0 %v2237_v15  ;;  %v24_v29 = vld [vmem:[%s3473_s0 + $0x8] sm:$0xff]  ;;  %v2239_v32 = vpack.c.bf16 %v36_v28, %v33_v27  ;;  %v42_v36 = vld [vmem:[%s3472_s2 + $0x58] sm:$0xff]  ;;  %v355_v38 = vld [vmem:[%s3474_s3 + $0xb0] sm:$0xff]  ;;  %v2955_v41 = vpack.c.bf16 %v348_v34, %v345_v31 }
   0xa   :  { %2248 = vmatprep.subr.bf16.mxu0 %v2883_v16  ;;  %v352_v37 = vld [vmem:[%s3474_s3 + $0x98] sm:$0xff]  ;;  %v2243_v39 = vpack.c.bf16 %v42_v36, %v39_v35  ;;  %v25_v40 = vld [vmem:[%s3473_s0 + $0x10] sm:$0xff]  ;;  %v338_v43 = vld [vmem:[%s3474_s3 + $0x28] sm:$0xff] }
   0xb   :  { %2240 = vmatprep.subr.bf16.mxu1 %v2239_v32  ;;  %v335_v42 = vld [vmem:[%s3474_s3 + $0x10] sm:$0xff]  ;;  %v2964_v44 = vpack.c.bf16 %v355_v38, %v352_v37  ;;  %v354_v46 = vld [vmem:[%s3474_s3 + $0xa8] sm:$0xff]  ;;  %v361_v48 = vld [vmem:[%s3474_s3 + $0xe0] sm:$0xff] }
   0xc   :  { %1750 = vmatmul.mubr.msk.f32.vlgmr.msra.gmra.mrb[0].mxu0 %vm60_vm0, %v23_v12  ;;  %2242 = vmatpush3.bf16.msra.mxu1 %v2239_v32  ;;  %v351_v45 = vld [vmem:[%s3474_s3 + $0x90] sm:$0xff]  ;;  %v358_v47 = vld [vmem:[%s3474_s3 + $0xc8] sm:$0xff]  ;;  %v2979_v49 = vpack.c.bf16 %v338_v43, %v335_v42  ;;  %v26_v50 = vld [vmem:[%s3473_s0 + $0x18] sm:$0xff] }
   0xd   :  { %2250 = vmatpush1.bf16.msra.mxu0 %v2897_v21  ;;  %155 = vmatprep.mubr.f32.mxu0 %v2810_v3  ;;  %v2986_v51 = vpack.c.bf16 %v354_v46, %v351_v45  ;;  %v341_v52 = vld [vmem:[%s3474_s3 + $0x40] sm:$0xff]  ;;  %v344_v53 = vld [vmem:[%s3474_s3 + $0x58] sm:$0xff]  ;;  %v2995_v54 = vpack.c.bf16 %v361_v48, %v358_v47  ;;  %v367_v59 = vld [vmem:[%s3474_s3 + $0x110] sm:$0xff]  ;;  %v45_v45 = vlaneseq }
   0xe   :  { %2252 = vmatprep.subr.bf16.mxu0 %v2900_v22  ;;  %2244 = vmatprep.subr.bf16.mxu1 %v2243_v39  ;;  %v357_v55 = vld [vmem:[%s3474_s3 + $0xc0] sm:$0xff]  ;;  %v360_v56 = vld [vmem:[%s3474_s3 + $0xd8] sm:$0xff]  ;;  %v3013_v60 = vpack.c.bf16 %v344_v53, %v341_v52  ;;  %v347_v63 = vld [vmem:[%s3474_s3 + $0x70] sm:$0xff] }
   0xf   :  { %v364_v58 = vld [vmem:[%s3474_s3 + $0xf8] sm:$0xff]  ;;  %v27_v61 = vld [vmem:[%s3473_s0 + $0x20] sm:$0xff]  ;;  %v3020_v62 = vpack.c.bf16 %v360_v56, %v357_v55  ;;  %v350_v0 = vld [vmem:[%s3474_s3 + $0x88] sm:$0xff]  ;;  %v46_v46 = vshrl.u32 %v45_v45, 7 }
  0x10   :  { %1751 = vmatmul.mubr.msk.f32.gmra.mrb[2].mxu0 %vm60_vm0, %v24_v29  ;;  %2246 = vmatpush3.bf16.msra.mxu1 %v2243_v39  ;;  %v3029_v1 = vpack.c.bf16 %v367_v59, %v364_v58  ;;  %v363_v2 = vld [vmem:[%s3474_s3 + $0xf0] sm:$0xff]  ;;  %v366_v4 = vld [vmem:[%s3474_s3 + $0x108] sm:$0xff]  ;;  %v373_v6 = vld [vmem:[%s3474_s3 + $0x140] sm:$0xff]  ;;  %v3047_v7 = vpack.c.bf16 %v350_v0, %v347_v63 }
  0x11   :  { %2254 = vmatpush1.bf16.msra.mxu0 %v2926_v30  ;;  %161 = vmatprep.mubr.f32.mxu0 %v2810_v3  ;;  %v370_v5 = vld [vmem:[%s3474_s3 + $0x128] sm:$0xff]  ;;  %v3054_v9 = vpack.c.bf16 %v366_v4, %v363_v2  ;;  %v353_v10 = vld [vmem:[%s3474_s3 + $0xa0] sm:$0xff]  ;;  %v356_v11 = vld [vmem:[%s3474_s3 + $0xb8] sm:$0xff]  ;;  %v55_v47 = vsub.s32 2, %v46_v46  ;;  %v47_v63 = vsub.s32 0, %v46_v46 }
  0x12   :  { %2256 = vmatprep.subr.bf16.mxu0 %v2932_v33  ;;  %2279 = vmatprep.subr.bf16.mxu1 %v2811_v57  ;;  %v28_v8 = vld [vmem:[%s3473_s0 + $0x28] sm:$0xff]  ;;  %v3063_v12 = vpack.c.bf16 %v373_v6, %v370_v5  ;;  %v369_v13 = vld [vmem:[%s3474_s3 + $0x120] sm:$0xff]  ;;  %v372_v14 = vld [vmem:[%s3474_s3 + $0x138] sm:$0xff]  ;;  %v3081_v18 = vpack.c.bf16 %v356_v11, %v353_v10 }
  0x13   :  { %1940 = vmatmul.mubr.msk.f32.vlgmr.msra.gmra.mrb[0].mxu1 %vm60_vm0, %v24_v29  ;;  %v376_v15 = vld [vmem:[%s3474_s3 + $0x158] sm:$0xff]  ;;  %v379_v17 = vld [vmem:[%s3474_s3 + $0x170] sm:$0xff]  ;;  %v3088_v20 = vpack.c.bf16 %v372_v14, %v369_v13  ;;  %v362_v24 = vld [vmem:[%s3474_s3 + $0xe8] sm:$0xff] }
  0x14   :  { %1752 = vmatmul.mubr.msk.f32.gmra.mrb[4].mxu0 %vm60_vm0, %v25_v40  ;;  %2281 = vmatpush3.bf16.msra.mxu1 %v2979_v49  ;;  %v29_v19 = vld [vmem:[%s3473_s0 + $0x30] sm:$0xff]  ;;  %v3097_v25 = vpack.c.bf16 %v379_v17, %v376_v15  ;;  %v378_v27 = vld [vmem:[%s3474_s3 + $0x168] sm:$0xff]  ;;  %v30_v29 = vld [vmem:[%s3473_s0 + $0x38] sm:$0xff]  ;;  %v51_v15 = vsub.s32 1, %v46_v46 }
  0x15   :  { %2258 = vmatpush1.bf16.msra.mxu0 %v2955_v41  ;;  %167 = vmatprep.mubr.f32.mxu0 %v2810_v3  ;;  %v359_v23 = vld [vmem:[%s3474_s3 + $0xd0] sm:$0xff]  ;;  %v365_v32 = vld [vmem:[%s3474_s3 + $0x100] sm:$0xff]  ;;  %v368_v34 = vld [vmem:[%s3474_s3 + $0x118] sm:$0xff] }
  0x16   :  { %2260 = vmatprep.subr.bf16.mxu0 %v2964_v44  ;;  %2282 = vmatprep.subr.bf16.mxu1 %v2811_v57  ;;  %v375_v26 = vld [vmem:[%s3474_s3 + $0x150] sm:$0xff]  ;;  %v3109_v28 = vpack.c.bf16 %v362_v24, %v359_v23  ;;  %v3129_v35 = vpack.c.bf16 %v368_v34, %v365_v32  ;;  %v3136_v36 = vld [vmem:[%s3475_s1] sm:$0xff]  ;;  %v374_v38 = vld [vmem:[%s3474_s3 + $0x148] sm:$0xff] }
  0x17   :  { %1942 = vmatprep.mubr.msk.f32.mxu1 %vm60_vm0, %v25_v40  ;;  %v3116_v31 = vpack.c.bf16 %v378_v27, %v375_v26  ;;  %v371_v37 = vld [vmem:[%s3474_s3 + $0x130] sm:$0xff]  ;;  %v377_v40 = vld [vmem:[%s3474_s3 + $0x160] sm:$0xff]  ;;  %v380_v42 = vld [vmem:[%s3474_s3 + $0x178] sm:$0xff] }
  0x18   :  { %1753 = vmatmul.mubr.msk.f32.gmra.mrb[6].mxu0 %vm60_vm0, %v26_v50  ;;  %2284 = vmatpush3.bf16.msra.mxu1 %v3013_v60  ;;  %v3150_v39 = vpack.c.bf16 %v374_v38, %v371_v37  ;;  %v3165_v43 = vpack.c.bf16 %v380_v42, %v377_v40  ;;  %v43_v48 = vld [vmem:[%s3476_s4] sm:$0x7] }
  0x19   :  { %2262 = vmatpush1.bf16.msra.mxu0 %v2986_v51  ;;  %173 = vmatprep.mubr.f32.mxu0 %v2810_v3  ;;  %v3214_v5 = vrot.slane %v43_v48, %v47_v63  ;;  %v3223_v24 = vrot.slane %v43_v48, %v51_v15  ;;  %v3229_v38 = vld [vmem:[%s3477_s5] ss:$0 sm:$0xff] }
  0x1a   :  { %2264 = vmatprep.subr.bf16.mxu0 %v2995_v54  ;;  %2285 = vmatprep.subr.bf16.mxu1 %v2811_v57 }
  0x1b   :  { %1943 = vmatmul.mubr.msk.f32.gmra.mrb[2].mxu1 %vm60_vm0, %v26_v50  ;;  %v56_v50 = vrot.slane %v43_v48, %v55_v47 }
  0x1c   :  { %1754 = vmatmul.mubr.msk.f32.gmra.mrb[8].mxu0 %vm60_vm0, %v27_v61  ;;  %2287 = vmatpush3.bf16.msra.mxu1 %v3047_v7 }
  0x1d   :  { %2266 = vmatpush1.bf16.msra.mxu0 %v3020_v62  ;;  %179 = vmatprep.mubr.f32.mxu0 %v2810_v3 }
  0x1e   :  { %2268 = vmatprep.subr.bf16.mxu0 %v3029_v1  ;;  %2288 = vmatprep.subr.bf16.mxu1 %v2811_v57 }
  0x1f   :  { %1945 = vmatprep.mubr.msk.f32.mxu1 %vm60_vm0, %v27_v61 }
  0x20   :  { %1755 = vmatmul.mubr.msk.f32.gmra.mrb[10].mxu0 %vm60_vm0, %v28_v8  ;;  %2290 = vmatpush3.bf16.msra.mxu1 %v3081_v18 }
  0x21   :  { %2270 = vmatpush1.bf16.msra.mxu0 %v3054_v9  ;;  %185 = vmatprep.mubr.f32.mxu0 %v2810_v3 }
  0x22   :  { %2272 = vmatprep.subr.bf16.mxu0 %v3063_v12  ;;  %2291 = vmatprep.subr.bf16.mxu1 %v2811_v57 }
  0x23   :  { %1946 = vmatmul.mubr.msk.f32.gmra.mrb[4].mxu1 %vm60_vm0, %v28_v8 }
  0x24   :  { %1756 = vmatmul.mubr.msk.f32.gmra.mrb[12].mxu0 %vm60_vm0, %v29_v19  ;;  %2293 = vmatpush3.bf16.msra.mxu1 %v3109_v28 }
  0x25   :  { %2274 = vmatpush1.bf16.msra.mxu0 %v3088_v20  ;;  %191 = vmatprep.mubr.f32.mxu0 %v2810_v3 }
  0x26   :  { %2276 = vmatprep.subr.bf16.mxu0 %v3097_v25  ;;  %2294 = vmatprep.subr.bf16.mxu1 %v2811_v57 }
  0x27   :  { %1948 = vmatprep.mubr.msk.f32.mxu1 %vm60_vm0, %v29_v19 }
  0x28   :  { %1757 = vmatmul.mubr.msk.f32.gmra.mrb[14].mxu0 %vm60_vm0, %v30_v29  ;;  %1949 = vmatmul.mubr.msk.f32.gmra.mrb[6].mxu1 %vm60_vm0, %v30_v29 }
  0x29   :  { %2278 = vmatpush1.bf16.msra.mxu0 %v3116_v31  ;;  %459 = vmatprep.mubr.f32.mxu0 %v2810_v3 }
  0x2a   :  { %2304 = vmatprep.subr.bf16.mxu0 %v2883_v16  ;;  %2296 = vmatpush3.bf16.msra.mxu1 %v3129_v35 }
  0x2b   :  { %2297 = vmatprep.subr.bf16.mxu1 %v2811_v57  ;;  %1983 = vmatprep.mubr.msk.f32.mxu1 %vm2812_vm1, %v2810_v3 }
  0x2c   :  { %460 = vmatmul.mubr.f32.vlgmr.msra.gmra.mrb[0].mxu0 %v3136_v36 }
  0x2d   :  { %2306 = vmatpush1.bf16.msra.mxu0 %v2897_v21  ;;  %627 = vmatprep.mubr.f32.mxu0 %v2810_v3 }
  0x2e   :  { %2308 = vmatprep.subr.bf16.mxu0 %v2900_v22  ;;  %2299 = vmatpush3.bf16.msra.mxu1 %v3150_v39 }
  0x2f   :  { %2300 = vmatprep.subr.bf16.mxu1 %v2811_v57 }
  0x31   :  { %2310 = vmatpush1.bf16.msra.mxu0 %v2926_v30 }
  0x32   :  { %2312 = vmatprep.subr.bf16.mxu0 %v2932_v33  ;;  %2302 = vmatpush3.bf16.msra.mxu1 %v3165_v43 }
  0x33   :  { %2335 = vmatprep.subr.bf16.mxu1 %v2811_v57 }
  0x35   :  { %2314 = vmatpush1.bf16.msra.mxu0 %v2955_v41  ;;  %1984 = vmatmul.mubr.f32.vlgmr.msra.gmra.mrb[8].mxu1 %v3136_v36 }
  0x36   :  { %2316 = vmatprep.subr.bf16.mxu0 %v2964_v44  ;;  %2337 = vmatpush3.bf16.msra.mxu1 %v2979_v49 }
  0x37   :  { %2018 = vmatprep.mubr.msk.f32.mxu1 %vm2812_vm1, %v2810_v3  ;;  %2338 = vmatprep.subr.bf16.mxu1 %v2811_v57 }
  0x39   :  { %2318 = vmatpush1.bf16.msra.mxu0 %v2986_v51 }
  0x3a   :  { %2320 = vmatprep.subr.bf16.mxu0 %v2995_v54  ;;  %2340 = vmatpush3.bf16.msra.mxu1 %v3013_v60 }
  0x3b   :  { %2341 = vmatprep.subr.bf16.mxu1 %v2811_v57 }
  0x3d   :  { %2322 = vmatpush1.bf16.msra.mxu0 %v3020_v62 }
  0x3e   :  { %2324 = vmatprep.subr.bf16.mxu0 %v3029_v1  ;;  %2343 = vmatpush3.bf16.msra.mxu1 %v3047_v7 }
  0x3f   :  { %2344 = vmatprep.subr.bf16.mxu1 %v2811_v57 }
  0x41   :  { %2326 = vmatpush1.bf16.msra.mxu0 %v3054_v9 }
  0x42   :  { %2328 = vmatprep.subr.bf16.mxu0 %v3063_v12  ;;  %2346 = vmatpush3.bf16.msra.mxu1 %v3081_v18 }
  0x43   :  { %2347 = vmatprep.subr.bf16.mxu1 %v2811_v57 }
  0x45   :  { %2330 = vmatpush1.bf16.msra.mxu0 %v3088_v20 }
  0x46   :  { %2332 = vmatprep.subr.bf16.mxu0 %v3097_v25  ;;  %2349 = vmatpush3.bf16.msra.mxu1 %v3109_v28 }
  0x47   :  { %2350 = vmatprep.subr.bf16.mxu1 %v2811_v57 }
  0x49   :  { %2334 = vmatpush1.bf16.msra.mxu0 %v3116_v31 }
  0x4a   :  { %2360 = vmatprep.subr.bf16.mxu0 %v2883_v16  ;;  %2352 = vmatpush3.bf16.msra.mxu1 %v3129_v35 }
  0x4b   :  { %2353 = vmatprep.subr.bf16.mxu1 %v2811_v57 }
  0x4e   :  { %2355 = vmatpush3.bf16.msra.mxu1 %v3150_v39 }
  0x4f   :  { %2356 = vmatprep.subr.bf16.mxu1 %v2811_v57 }
  0x52   :  { %2358 = vmatpush3.bf16.msra.mxu1 %v3165_v43 }
  0x53   :  { %2391 = vmatprep.subr.bf16.mxu1 %v2811_v57 }
  0xe6   :  { %v1941_v52 = vpop.f32.mrb[0].mxu1 }
  0xe7   :  { %v3206_v53 = vadd.f32 %v1941_v52, %v56_v50  ;;  %v264_v55 = vpop.f32.mrb[1].mxu1 }
  0xe8   :  { %v265_v46 = vadd.f32 %v264_v55, %v56_v50 }
  0xee   :  { %v1944_v56 = vpop.f32.mrb[2].mxu1 }
  0xef   :  { %v3208_v58 = vadd.f32 %v1944_v56, %v56_v50  ;;  %v274_v59 = vpop.f32.mrb[3].mxu1 }
  0xf0   :  { %v3210_v61 = vadd.f32 %v274_v59, %v56_v50 }
  0xf6   :  { %v1947_v0 = vpop.f32.mrb[4].mxu1 }
  0xf7   :  { %v3212_v2 = vadd.f32 %v1947_v0, %v56_v50  ;;  %v284_v4 = vpop.f32.mrb[5].mxu1 }
  0xf8   :  { %v3216_v6 = vadd.f32 %v284_v4, %v56_v50 }
  0xfb   :  { %v1950_v8 = vpop.f32.mrb[6].mxu1 }
  0xfc   :  { %v3218_v11 = vadd.f32 %v1950_v8, %v56_v50  ;;  %v294_v13 = vpop.f32.mrb[7].mxu1 }
  0xfd   :  { %v3221_v19 = vadd.f32 %v294_v13, %v56_v50 }
  0xff   :  { %v461_v10 = vpop.f32.mrb[0].mxu0 }
 0x100   :  { %v2695_v14 = vadd.f32 %v461_v10, %v3214_v5  ;;  %v463_v17 = vpop.f32.mrb[1].mxu0 }
 0x101   :  { %v2696_v26 = vadd.f32 %v463_v17, %v3223_v24 }
 0x102   :  { %v1767_v23 = vmul.f32 -1.442695, %v2695_v14 }
 0x103   :  { %v1768_v32 = vmul.f32 -1.442695, %v2696_v26 }
 0x104   :  { %2730 = vpow2.f32 %v1767_v23 }
 0x105   :  { %2732 = vpow2.f32 %v1768_v32 }
 0x108   :  { %v532_v27 = vpop.f32.mrb[8].mxu1 }
 0x109   :  { %v1985_v29 = vpop.f32.mrb[9].mxu1  ;;  %v550_v40 = vadd.f32 %v3229_v38, %v532_v27 }
 0x10e   :  { %v2731_v34 = vpop.eup %2730 }
 0x10f   :  { %v544_v37 = vadd.f32 1.0, %v2731_v34  ;;  %v2733_v42 = vpop.eup %2732 }
 0x110   :  { %v545_v48 = vadd.f32 1.0, %v2733_v42 }
 0x111   :  { %2734 = vrcp.f32 %v544_v37 }
 0x11b   :  { %v2735_v45 = vpop.eup %2734 }
 0x11c   :  { %v551_v47 = vmul.f32 %v2735_v45, %v550_v40 }
 0x11e   :  { %v552_v52 = vadd.f32 %v551_v47, %v265_v46 }
 0x120   :  { %2736 = vtanh.f32 %v552_v52 }
 0x121   :  { %2738 = vrcp.f32 %v545_v48 }
 0x12a   :  { %v2737_v56 = vpop.eup %2736 }
 0x12b   :  { %v554_v59 = vsub.f32 %v3136_v36, %v2737_v56  ;;  %v2739_v63 = vpop.eup %2738 }
 0x12d   :  { %v555_v0 = vmul.f32 %v2739_v63, %v554_v59 }
 0x12f   :  { %v556_v4 = vadd.f32 %v2737_v56, %v555_v0 }
 0x131   :  { %628 = vmatmul.mubr.f32.vlgmr.msra.gmra.mrb[2].mxu0 %v556_v4  ;;  %2019 = vmatmul.mubr.f32.vlgmr.msra.gmra.mrb[10].mxu1 %v556_v4 }
 0x132   :  { %2362 = vmatpush1.bf16.msra.mxu0 %v2897_v21  ;;  %2393 = vmatpush3.bf16.msra.mxu1 %v2979_v49 }
 0x133   :  { %2364 = vmatprep.subr.bf16.mxu0 %v2900_v22  ;;  %2394 = vmatprep.subr.bf16.mxu1 %v2811_v57 }
 0x134   :  { %795 = vmatprep.mubr.f32.mxu0 %v2810_v3  ;;  %2053 = vmatprep.mubr.msk.f32.mxu1 %vm2812_vm1, %v2810_v3 }
 0x136   :  { %2366 = vmatpush1.bf16.msra.mxu0 %v2926_v30  ;;  %2396 = vmatpush3.bf16.msra.mxu1 %v3013_v60 }
 0x137   :  { %2368 = vmatprep.subr.bf16.mxu0 %v2932_v33  ;;  %2397 = vmatprep.subr.bf16.mxu1 %v2811_v57 }
 0x13a   :  { %2370 = vmatpush1.bf16.msra.mxu0 %v2955_v41  ;;  %2399 = vmatpush3.bf16.msra.mxu1 %v3047_v7 }
 0x13b   :  { %2372 = vmatprep.subr.bf16.mxu0 %v2964_v44  ;;  %2400 = vmatprep.subr.bf16.mxu1 %v2811_v57 }
 0x13e   :  { %2374 = vmatpush1.bf16.msra.mxu0 %v2986_v51  ;;  %2402 = vmatpush3.bf16.msra.mxu1 %v3081_v18 }
 0x13f   :  { %2376 = vmatprep.subr.bf16.mxu0 %v2995_v54  ;;  %2403 = vmatprep.subr.bf16.mxu1 %v2811_v57 }
 0x142   :  { %2378 = vmatpush1.bf16.msra.mxu0 %v3020_v62  ;;  %2405 = vmatpush3.bf16.msra.mxu1 %v3109_v28 }
 0x143   :  { %2380 = vmatprep.subr.bf16.mxu0 %v3029_v1  ;;  %2406 = vmatprep.subr.bf16.mxu1 %v2811_v57 }
 0x146   :  { %2382 = vmatpush1.bf16.msra.mxu0 %v3054_v9  ;;  %2408 = vmatpush3.bf16.msra.mxu1 %v3129_v35 }
 0x147   :  { %2384 = vmatprep.subr.bf16.mxu0 %v3063_v12  ;;  %2409 = vmatprep.subr.bf16.mxu1 %v2811_v57 }
 0x14a   :  { %2386 = vmatpush1.bf16.msra.mxu0 %v3088_v20  ;;  %2411 = vmatpush3.bf16.msra.mxu1 %v3150_v39 }
 0x14b   :  { %2388 = vmatprep.subr.bf16.mxu0 %v3097_v25  ;;  %2412 = vmatprep.subr.bf16.mxu1 %v2811_v57 }
 0x14e   :  { %2390 = vmatpush1.bf16.msra.mxu0 %v3116_v31  ;;  %2414 = vmatpush3.bf16.msra.mxu1 %v3165_v43 }
 0x14f   :  { %2416 = vmatprep.subr.bf16.mxu0 %v2883_v16  ;;  %2447 = vmatprep.subr.bf16.mxu1 %v2811_v57 }
 0x204   :  { %v629_v36 = vpop.f32.mrb[2].mxu0  ;;  %v700_v50 = vpop.f32.mrb[10].mxu1 }
 0x205   :  { %v2697_v55 = vadd.f32 %v629_v36, %v3214_v5  ;;  %v631_v8 = vpop.f32.mrb[3].mxu0  ;;  %v2020_v10 = vpop.f32.mrb[11].mxu1  ;;  %v718_v27 = vadd.f32 %v3229_v38, %v700_v50 }
 0x206   :  { %v2698_v14 = vadd.f32 %v631_v8, %v3223_v24 }
 0x207   :  { %v1769_v13 = vmul.f32 -1.442695, %v2697_v55 }
 0x208   :  { %v1770_v15 = vmul.f32 -1.442695, %v2698_v14 }
 0x209   :  { %2740 = vpow2.f32 %v1769_v13 }
 0x20a   :  { %2742 = vpow2.f32 %v1770_v15 }
 0x213   :  { %v2741_v17 = vpop.eup %2740 }
 0x214   :  { %v712_v23 = vadd.f32 1.0, %v2741_v17  ;;  %v2743_v26 = vpop.eup %2742 }
 0x215   :  { %v713_v37 = vadd.f32 1.0, %v2743_v26 }
 0x216   :  { %2744 = vrcp.f32 %v712_v23 }
 0x220   :  { %v2745_v29 = vpop.eup %2744 }
 0x221   :  { %v719_v32 = vmul.f32 %v2745_v29, %v718_v27 }
 0x223   :  { %v720_v34 = vadd.f32 %v719_v32, %v3206_v53 }
 0x225   :  { %2746 = vtanh.f32 %v720_v34 }
 0x226   :  { %2748 = vrcp.f32 %v713_v37 }
 0x22f   :  { %v2747_v40 = vpop.eup %2746 }
 0x230   :  { %v722_v42 = vsub.f32 %v556_v4, %v2747_v40  ;;  %v2749_v45 = vpop.eup %2748 }
 0x232   :  { %v723_v46 = vmul.f32 %v2749_v45, %v722_v42 }
 0x234   :  { %v724_v47 = vadd.f32 %v2747_v40, %v723_v46 }
 0x236   :  { %796 = vmatmul.mubr.f32.vlgmr.msra.gmra.mrb[4].mxu0 %v724_v47  ;;  %2054 = vmatmul.mubr.f32.vlgmr.msra.gmra.mrb[12].mxu1 %v724_v47 }
 0x237   :  { %2418 = vmatpush1.bf16.msra.mxu0 %v2897_v21  ;;  %2449 = vmatpush3.bf16.msra.mxu1 %v2979_v49 }
 0x238   :  { %2420 = vmatprep.subr.bf16.mxu0 %v2900_v22  ;;  %2450 = vmatprep.subr.bf16.mxu1 %v2811_v57 }
 0x239   :  { %963 = vmatprep.mubr.f32.mxu0 %v2810_v3  ;;  %2088 = vmatprep.mubr.msk.f32.mxu1 %vm2812_vm1, %v2810_v3 }
 0x23b   :  { %2422 = vmatpush1.bf16.msra.mxu0 %v2926_v30  ;;  %2452 = vmatpush3.bf16.msra.mxu1 %v3013_v60 }
 0x23c   :  { %2424 = vmatprep.subr.bf16.mxu0 %v2932_v33  ;;  %2453 = vmatprep.subr.bf16.mxu1 %v2811_v57 }
 0x23f   :  { %2426 = vmatpush1.bf16.msra.mxu0 %v2955_v41  ;;  %2455 = vmatpush3.bf16.msra.mxu1 %v3047_v7 }
 0x240   :  { %2428 = vmatprep.subr.bf16.mxu0 %v2964_v44  ;;  %2456 = vmatprep.subr.bf16.mxu1 %v2811_v57 }
 0x243   :  { %2430 = vmatpush1.bf16.msra.mxu0 %v2986_v51  ;;  %2458 = vmatpush3.bf16.msra.mxu1 %v3081_v18 }
 0x244   :  { %2432 = vmatprep.subr.bf16.mxu0 %v2995_v54  ;;  %2459 = vmatprep.subr.bf16.mxu1 %v2811_v57 }
 0x247   :  { %2434 = vmatpush1.bf16.msra.mxu0 %v3020_v62  ;;  %2461 = vmatpush3.bf16.msra.mxu1 %v3109_v28 }
 0x248   :  { %2436 = vmatprep.subr.bf16.mxu0 %v3029_v1  ;;  %2462 = vmatprep.subr.bf16.mxu1 %v2811_v57 }
 0x24b   :  { %2438 = vmatpush1.bf16.msra.mxu0 %v3054_v9  ;;  %2464 = vmatpush3.bf16.msra.mxu1 %v3129_v35 }
 0x24c   :  { %2440 = vmatprep.subr.bf16.mxu0 %v3063_v12  ;;  %2465 = vmatprep.subr.bf16.mxu1 %v2811_v57 }
 0x24f   :  { %2442 = vmatpush1.bf16.msra.mxu0 %v3088_v20  ;;  %2467 = vmatpush3.bf16.msra.mxu1 %v3150_v39 }
 0x250   :  { %2444 = vmatprep.subr.bf16.mxu0 %v3097_v25  ;;  %2468 = vmatprep.subr.bf16.mxu1 %v2811_v57 }
 0x253   :  { %2446 = vmatpush1.bf16.msra.mxu0 %v3116_v31  ;;  %2470 = vmatpush3.bf16.msra.mxu1 %v3165_v43 }
 0x254   :  { %2472 = vmatprep.subr.bf16.mxu0 %v2883_v16  ;;  %2503 = vmatprep.subr.bf16.mxu1 %v2811_v57 }
 0x309   :  { %v797_v53 = vpop.f32.mrb[4].mxu0  ;;  %v868_v48 = vpop.f32.mrb[12].mxu1 }
 0x30a   :  { %v2699_v52 = vadd.f32 %v797_v53, %v3214_v5  ;;  %v799_v56 = vpop.f32.mrb[5].mxu0  ;;  %v2055_v59 = vpop.f32.mrb[13].mxu1  ;;  %v886_v8 = vadd.f32 %v3229_v38, %v868_v48 }
 0x30b   :  { %v2700_v0 = vadd.f32 %v799_v56, %v3223_v24 }
 0x30c   :  { %v1771_v63 = vmul.f32 -1.442695, %v2699_v52 }
 0x30d   :  { %v1772_v4 = vmul.f32 -1.442695, %v2700_v0 }
 0x30e   :  { %2750 = vpow2.f32 %v1771_v63 }
 0x30f   :  { %2752 = vpow2.f32 %v1772_v4 }
 0x318   :  { %v2751_v36 = vpop.eup %2750 }
 0x319   :  { %v880_v50 = vadd.f32 1.0, %v2751_v36  ;;  %v2753_v55 = vpop.eup %2752 }
 0x31a   :  { %v881_v15 = vadd.f32 1.0, %v2753_v55 }
 0x31b   :  { %2754 = vrcp.f32 %v880_v50 }
 0x325   :  { %v2755_v10 = vpop.eup %2754 }
 0x326   :  { %v887_v13 = vmul.f32 %v2755_v10, %v886_v8 }
 0x328   :  { %v888_v14 = vadd.f32 %v887_v13, %v3210_v61 }
 0x32a   :  { %2756 = vtanh.f32 %v888_v14 }
 0x32b   :  { %2758 = vrcp.f32 %v881_v15 }
 0x334   :  { %v2757_v17 = vpop.eup %2756 }
 0x335   :  { %v890_v23 = vsub.f32 %v724_v47, %v2757_v17  ;;  %v2759_v26 = vpop.eup %2758 }
 0x337   :  { %v891_v27 = vmul.f32 %v2759_v26, %v890_v23 }
 0x339   :  { %v892_v29 = vadd.f32 %v2757_v17, %v891_v27 }
 0x33b   :  { %964 = vmatmul.mubr.f32.vlgmr.msra.gmra.mrb[6].mxu0 %v892_v29  ;;  %2089 = vmatmul.mubr.f32.vlgmr.msra.gmra.mrb[14].mxu1 %v892_v29 }
 0x33c   :  { %2474 = vmatpush1.bf16.msra.mxu0 %v2897_v21  ;;  %2505 = vmatpush3.bf16.msra.mxu1 %v2979_v49 }
 0x33d   :  { %2476 = vmatprep.subr.bf16.mxu0 %v2900_v22  ;;  %2506 = vmatprep.subr.bf16.mxu1 %v2811_v57 }
 0x33e   :  { %1131 = vmatprep.mubr.f32.mxu0 %v2810_v3  ;;  %2123 = vmatprep.mubr.msk.f32.mxu1 %vm2812_vm1, %v2810_v3 }
 0x340   :  { %2478 = vmatpush1.bf16.msra.mxu0 %v2926_v30  ;;  %2508 = vmatpush3.bf16.msra.mxu1 %v3013_v60 }
 0x341   :  { %2480 = vmatprep.subr.bf16.mxu0 %v2932_v33  ;;  %2509 = vmatprep.subr.bf16.mxu1 %v2811_v57 }
 0x344   :  { %2482 = vmatpush1.bf16.msra.mxu0 %v2955_v41  ;;  %2511 = vmatpush3.bf16.msra.mxu1 %v3047_v7 }
 0x345   :  { %2484 = vmatprep.subr.bf16.mxu0 %v2964_v44  ;;  %2512 = vmatprep.subr.bf16.mxu1 %v2811_v57 }
 0x348   :  { %2486 = vmatpush1.bf16.msra.mxu0 %v2986_v51  ;;  %2514 = vmatpush3.bf16.msra.mxu1 %v3081_v18 }
 0x349   :  { %2488 = vmatprep.subr.bf16.mxu0 %v2995_v54  ;;  %2515 = vmatprep.subr.bf16.mxu1 %v2811_v57 }
 0x34c   :  { %2490 = vmatpush1.bf16.msra.mxu0 %v3020_v62  ;;  %2517 = vmatpush3.bf16.msra.mxu1 %v3109_v28 }
 0x34d   :  { %2492 = vmatprep.subr.bf16.mxu0 %v3029_v1  ;;  %2518 = vmatprep.subr.bf16.mxu1 %v2811_v57 }
 0x350   :  { %2494 = vmatpush1.bf16.msra.mxu0 %v3054_v9  ;;  %2520 = vmatpush3.bf16.msra.mxu1 %v3129_v35 }
 0x351   :  { %2496 = vmatprep.subr.bf16.mxu0 %v3063_v12  ;;  %2521 = vmatprep.subr.bf16.mxu1 %v2811_v57 }
 0x354   :  { %2498 = vmatpush1.bf16.msra.mxu0 %v3088_v20  ;;  %2523 = vmatpush3.bf16.msra.mxu1 %v3150_v39 }
 0x355   :  { %2500 = vmatprep.subr.bf16.mxu0 %v3097_v25  ;;  %2524 = vmatprep.subr.bf16.mxu1 %v2811_v57 }
 0x358   :  { %2502 = vmatpush1.bf16.msra.mxu0 %v3116_v31  ;;  %2526 = vmatpush3.bf16.msra.mxu1 %v3165_v43 }
 0x359   :  { %2528 = vmatprep.subr.bf16.mxu0 %v2883_v16  ;;  %2559 = vmatprep.subr.bf16.mxu1 %v2811_v57 }
 0x40e   :  { %v965_v61 = vpop.f32.mrb[6].mxu0  ;;  %v1036_v32 = vpop.f32.mrb[14].mxu1 }
 0x40f   :  { %v2701_v34 = vadd.f32 %v965_v61, %v3214_v5  ;;  %v967_v37 = vpop.f32.mrb[7].mxu0  ;;  %v2090_v40 = vpop.f32.mrb[15].mxu1  ;;  %v1054_v52 = vadd.f32 %v3229_v38, %v1036_v32 }
 0x410   :  { %v2702_v45 = vadd.f32 %v967_v37, %v3223_v24 }
 0x411   :  { %v1773_v42 = vmul.f32 -1.442695, %v2701_v34 }
 0x412   :  { %v1774_v46 = vmul.f32 -1.442695, %v2702_v45 }
 0x413   :  { %2760 = vpow2.f32 %v1773_v42 }
 0x414   :  { %2762 = vpow2.f32 %v1774_v46 }
 0x41d   :  { %v2761_v47 = vpop.eup %2760 }
 0x41e   :  { %v1048_v53 = vadd.f32 1.0, %v2761_v47  ;;  %v2763_v48 = vpop.eup %2762 }
 0x41f   :  { %v1049_v0 = vadd.f32 1.0, %v2763_v48 }
 0x420   :  { %2764 = vrcp.f32 %v1048_v53 }
 0x42a   :  { %v2765_v56 = vpop.eup %2764 }
 0x42b   :  { %v1055_v59 = vmul.f32 %v2765_v56, %v1054_v52 }
 0x42d   :  { %v1056_v63 = vadd.f32 %v1055_v59, %v3208_v58 }
 0x42f   :  { %2766 = vtanh.f32 %v1056_v63 }
 0x430   :  { %2768 = vrcp.f32 %v1049_v0 }
 0x439   :  { %v2767_v4 = vpop.eup %2766 }
 0x43a   :  { %v1058_v36 = vsub.f32 %v892_v29, %v2767_v4  ;;  %v2769_v50 = vpop.eup %2768 }
 0x43c   :  { %v1059_v55 = vmul.f32 %v2769_v50, %v1058_v36 }
 0x43e   :  { %v1060_v8 = vadd.f32 %v2767_v4, %v1059_v55 }
 0x440   :  { %1132 = vmatmul.mubr.f32.vlgmr.msra.gmra.mrb[8].mxu0 %v1060_v8  ;;  %2124 = vmatmul.mubr.f32.vlgmr.msra.gmra.mrb[16].mxu1 %v1060_v8 }
 0x441   :  { %2530 = vmatpush1.bf16.msra.mxu0 %v2897_v21  ;;  %2561 = vmatpush3.bf16.msra.mxu1 %v2979_v49 }
 0x442   :  { %2532 = vmatprep.subr.bf16.mxu0 %v2900_v22  ;;  %2562 = vmatprep.subr.bf16.mxu1 %v2811_v57 }
 0x443   :  { %1299 = vmatprep.mubr.f32.mxu0 %v2810_v3  ;;  %2158 = vmatprep.mubr.msk.f32.mxu1 %vm2812_vm1, %v2810_v3 }
 0x445   :  { %2534 = vmatpush1.bf16.msra.mxu0 %v2926_v30  ;;  %2564 = vmatpush3.bf16.msra.mxu1 %v3013_v60 }
 0x446   :  { %2536 = vmatprep.subr.bf16.mxu0 %v2932_v33  ;;  %2565 = vmatprep.subr.bf16.mxu1 %v2811_v57 }
 0x449   :  { %2538 = vmatpush1.bf16.msra.mxu0 %v2955_v41  ;;  %2567 = vmatpush3.bf16.msra.mxu1 %v3047_v7 }
 0x44a   :  { %2540 = vmatprep.subr.bf16.mxu0 %v2964_v44  ;;  %2568 = vmatprep.subr.bf16.mxu1 %v2811_v57 }
 0x44d   :  { %2542 = vmatpush1.bf16.msra.mxu0 %v2986_v51  ;;  %2570 = vmatpush3.bf16.msra.mxu1 %v3081_v18 }
 0x44e   :  { %2544 = vmatprep.subr.bf16.mxu0 %v2995_v54  ;;  %2571 = vmatprep.subr.bf16.mxu1 %v2811_v57 }
 0x451   :  { %2546 = vmatpush1.bf16.msra.mxu0 %v3020_v62  ;;  %2573 = vmatpush3.bf16.msra.mxu1 %v3109_v28 }
 0x452   :  { %2548 = vmatprep.subr.bf16.mxu0 %v3029_v1  ;;  %2574 = vmatprep.subr.bf16.mxu1 %v2811_v57 }
 0x455   :  { %2550 = vmatpush1.bf16.msra.mxu0 %v3054_v9  ;;  %2576 = vmatpush3.bf16.msra.mxu1 %v3129_v35 }
 0x456   :  { %2552 = vmatprep.subr.bf16.mxu0 %v3063_v12  ;;  %2577 = vmatprep.subr.bf16.mxu1 %v2811_v57 }
 0x459   :  { %2554 = vmatpush1.bf16.msra.mxu0 %v3088_v20  ;;  %2579 = vmatpush3.bf16.msra.mxu1 %v3150_v39 }
 0x45a   :  { %2556 = vmatprep.subr.bf16.mxu0 %v3097_v25  ;;  %2580 = vmatprep.subr.bf16.mxu1 %v2811_v57 }
 0x45d   :  { %2558 = vmatpush1.bf16.msra.mxu0 %v3116_v31  ;;  %2582 = vmatpush3.bf16.msra.mxu1 %v3165_v43 }
 0x45e   :  { %2584 = vmatprep.subr.bf16.mxu0 %v2883_v16  ;;  %2615 = vmatprep.subr.bf16.mxu1 %v2811_v57 }
 0x513   :  { %v1133_v58 = vpop.f32.mrb[8].mxu0  ;;  %v1204_v10 = vpop.f32.mrb[16].mxu1 }
 0x514   :  { %v2703_v13 = vadd.f32 %v1133_v58, %v3214_v5  ;;  %v1135_v14 = vpop.f32.mrb[9].mxu0  ;;  %v2125_v15 = vpop.f32.mrb[17].mxu1  ;;  %v1222_v32 = vadd.f32 %v3229_v38, %v1204_v10 }
 0x515   :  { %v2704_v23 = vadd.f32 %v1135_v14, %v3223_v24 }
 0x516   :  { %v1775_v17 = vmul.f32 -1.442695, %v2703_v13 }
 0x517   :  { %v1776_v26 = vmul.f32 -1.442695, %v2704_v23 }
 0x518   :  { %2770 = vpow2.f32 %v1775_v17 }
 0x519   :  { %2772 = vpow2.f32 %v1776_v26 }
 0x522   :  { %v2771_v27 = vpop.eup %2770 }
 0x523   :  { %v1216_v29 = vadd.f32 1.0, %v2771_v27  ;;  %v2773_v61 = vpop.eup %2772 }
 0x524   :  { %v1217_v42 = vadd.f32 1.0, %v2773_v61 }
 0x525   :  { %2774 = vrcp.f32 %v1216_v29 }
 0x52f   :  { %v2775_v34 = vpop.eup %2774 }
 0x530   :  { %v1223_v37 = vmul.f32 %v2775_v34, %v1222_v32 }
 0x532   :  { %v1224_v40 = vadd.f32 %v1223_v37, %v3216_v6 }
 0x534   :  { %2776 = vtanh.f32 %v1224_v40 }
 0x535   :  { %2778 = vrcp.f32 %v1217_v42 }
 0x53e   :  { %v2777_v45 = vpop.eup %2776 }
 0x53f   :  { %v1226_v46 = vsub.f32 %v1060_v8, %v2777_v45  ;;  %v2779_v47 = vpop.eup %2778 }
 0x541   :  { %v1227_v53 = vmul.f32 %v2779_v47, %v1226_v46 }
 0x543   :  { %v1228_v48 = vadd.f32 %v2777_v45, %v1227_v53 }
 0x545   :  { %1300 = vmatmul.mubr.f32.vlgmr.msra.gmra.mrb[10].mxu0 %v1228_v48  ;;  %2159 = vmatmul.mubr.f32.vlgmr.msra.gmra.mrb[18].mxu1 %v1228_v48 }
 0x546   :  { %2586 = vmatpush1.bf16.msra.mxu0 %v2897_v21  ;;  %2617 = vmatpush3.bf16.msra.mxu1 %v2979_v49 }
 0x547   :  { %2588 = vmatprep.subr.bf16.mxu0 %v2900_v22  ;;  %2618 = vmatprep.subr.bf16.mxu1 %v2811_v57 }
 0x548   :  { %1467 = vmatprep.mubr.f32.mxu0 %v2810_v3  ;;  %2193 = vmatprep.mubr.msk.f32.mxu1 %vm2812_vm1, %v2810_v3 }
 0x54a   :  { %2590 = vmatpush1.bf16.msra.mxu0 %v2926_v30  ;;  %2620 = vmatpush3.bf16.msra.mxu1 %v3013_v60 }
 0x54b   :  { %2592 = vmatprep.subr.bf16.mxu0 %v2932_v33  ;;  %2621 = vmatprep.subr.bf16.mxu1 %v2811_v57 }
 0x54e   :  { %2594 = vmatpush1.bf16.msra.mxu0 %v2955_v41  ;;  %2623 = vmatpush3.bf16.msra.mxu1 %v3047_v7 }
 0x54f   :  { %2596 = vmatprep.subr.bf16.mxu0 %v2964_v44  ;;  %2624 = vmatprep.subr.bf16.mxu1 %v2811_v57 }
 0x552   :  { %2598 = vmatpush1.bf16.msra.mxu0 %v2986_v51  ;;  %2626 = vmatpush3.bf16.msra.mxu1 %v3081_v18 }
 0x553   :  { %2600 = vmatprep.subr.bf16.mxu0 %v2995_v54  ;;  %2627 = vmatprep.subr.bf16.mxu1 %v2811_v57 }
 0x556   :  { %2602 = vmatpush1.bf16.msra.mxu0 %v3020_v62  ;;  %2629 = vmatpush3.bf16.msra.mxu1 %v3109_v28 }
 0x557   :  { %2604 = vmatprep.subr.bf16.mxu0 %v3029_v1  ;;  %2630 = vmatprep.subr.bf16.mxu1 %v2811_v57 }
 0x55a   :  { %2606 = vmatpush1.bf16.msra.mxu0 %v3054_v9  ;;  %2632 = vmatpush3.bf16.msra.mxu1 %v3129_v35 }
 0x55b   :  { %2608 = vmatprep.subr.bf16.mxu0 %v3063_v12  ;;  %2633 = vmatprep.subr.bf16.mxu1 %v2811_v57 }
 0x55e   :  { %2610 = vmatpush1.bf16.msra.mxu0 %v3088_v20  ;;  %2635 = vmatpush3.bf16.msra.mxu1 %v3150_v39 }
 0x55f   :  { %2612 = vmatprep.subr.bf16.mxu0 %v3097_v25  ;;  %2636 = vmatprep.subr.bf16.mxu1 %v2811_v57 }
 0x562   :  { %2614 = vmatpush1.bf16.msra.mxu0 %v3116_v31  ;;  %2638 = vmatpush3.bf16.msra.mxu1 %v3165_v43 }
 0x563   :  { %2640 = vmatprep.subr.bf16.mxu0 %v2883_v16  ;;  %2671 = vmatprep.subr.bf16.mxu1 %v2811_v57 }
 0x618   :  { %v1301_v6 = vpop.f32.mrb[10].mxu0  ;;  %v1372_v52 = vpop.f32.mrb[18].mxu1 }
 0x619   :  { %v2705_v56 = vadd.f32 %v1301_v6, %v3214_v5  ;;  %v1303_v59 = vpop.f32.mrb[11].mxu0  ;;  %v2160_v63 = vpop.f32.mrb[19].mxu1  ;;  %v1390_v16 = vadd.f32 %v3229_v38, %v1372_v52 }
 0x61a   :  { %v2706_v4 = vadd.f32 %v1303_v59, %v3223_v24 }
 0x61b   :  { %v1777_v0 = vmul.f32 -1.442695, %v2705_v56 }
 0x61c   :  { %v1778_v36 = vmul.f32 -1.442695, %v2706_v4 }
 0x61d   :  { %2780 = vpow2.f32 %v1777_v0 }
 0x61e   :  { %2782 = vpow2.f32 %v1778_v36 }
 0x627   :  { %v2781_v50 = vpop.eup %2780 }
 0x628   :  { %v1384_v55 = vadd.f32 1.0, %v2781_v50  ;;  %v2783_v8 = vpop.eup %2782 }
 0x629   :  { %v1385_v14 = vadd.f32 1.0, %v2783_v8 }
 0x62a   :  { %2784 = vrcp.f32 %v1384_v55 }
 0x634   :  { %v2785_v58 = vpop.eup %2784 }
 0x635   :  { %v1391_v10 = vmul.f32 %v2785_v58, %v1390_v16 }
 0x637   :  { %v1392_v13 = vadd.f32 %v1391_v10, %v3212_v2 }
 0x639   :  { %2786 = vtanh.f32 %v1392_v13 }
 0x63a   :  { %2788 = vrcp.f32 %v1385_v14 }
 0x643   :  { %v2787_v15 = vpop.eup %2786 }
 0x644   :  { %v1394_v17 = vsub.f32 %v1228_v48, %v2787_v15  ;;  %v2789_v23 = vpop.eup %2788 }
 0x646   :  { %v1395_v26 = vmul.f32 %v2789_v23, %v1394_v17 }
 0x648   :  { %v1396_v27 = vadd.f32 %v2787_v15, %v1395_v26 }
 0x64a   :  { %1468 = vmatmul.mubr.f32.vlgmr.msra.gmra.mrb[12].mxu0 %v1396_v27  ;;  %2194 = vmatmul.mubr.f32.vlgmr.msra.gmra.mrb[20].mxu1 %v1396_v27 }
 0x64b   :  { %2642 = vmatpush1.bf16.msra.mxu0 %v2897_v21  ;;  %2673 = vmatpush3.bf16.msra.mxu1 %v2979_v49 }
 0x64c   :  { %2644 = vmatprep.subr.bf16.mxu0 %v2900_v22  ;;  %2674 = vmatprep.subr.bf16.mxu1 %v2811_v57 }
 0x64d   :  { %1635 = vmatprep.mubr.f32.mxu0 %v2810_v3  ;;  %2228 = vmatprep.mubr.msk.f32.mxu1 %vm2812_vm1, %v2810_v3 }
 0x64f   :  { %2646 = vmatpush1.bf16.msra.mxu0 %v2926_v30  ;;  %2676 = vmatpush3.bf16.msra.mxu1 %v3013_v60 }
 0x650   :  { %2648 = vmatprep.subr.bf16.mxu0 %v2932_v33  ;;  %2677 = vmatprep.subr.bf16.mxu1 %v2811_v57 }
 0x653   :  { %2650 = vmatpush1.bf16.msra.mxu0 %v2955_v41  ;;  %2679 = vmatpush3.bf16.msra.mxu1 %v3047_v7 }
 0x654   :  { %2652 = vmatprep.subr.bf16.mxu0 %v2964_v44  ;;  %2680 = vmatprep.subr.bf16.mxu1 %v2811_v57 }
 0x657   :  { %2654 = vmatpush1.bf16.msra.mxu0 %v2986_v51  ;;  %2682 = vmatpush3.bf16.msra.mxu1 %v3081_v18 }
 0x658   :  { %2656 = vmatprep.subr.bf16.mxu0 %v2995_v54  ;;  %2683 = vmatprep.subr.bf16.mxu1 %v2811_v57 }
 0x65b   :  { %2658 = vmatpush1.bf16.msra.mxu0 %v3020_v62  ;;  %2685 = vmatpush3.bf16.msra.mxu1 %v3109_v28 }
 0x65c   :  { %2660 = vmatprep.subr.bf16.mxu0 %v3029_v1  ;;  %2686 = vmatprep.subr.bf16.mxu1 %v2811_v57 }
 0x65f   :  { %2662 = vmatpush1.bf16.msra.mxu0 %v3054_v9  ;;  %2688 = vmatpush3.bf16.msra.mxu1 %v3129_v35 }
 0x660   :  { %2664 = vmatprep.subr.bf16.mxu0 %v3063_v12  ;;  %2689 = vmatprep.subr.bf16.mxu1 %v2811_v57 }
 0x663   :  { %2666 = vmatpush1.bf16.msra.mxu0 %v3088_v20  ;;  %2691 = vmatpush3.bf16.msra.mxu1 %v3150_v39 }
 0x664   :  { %2668 = vmatprep.subr.bf16.mxu0 %v3097_v25  ;;  %2692 = vmatprep.subr.bf16.mxu1 %v2811_v57 }
 0x667   :  { %2670 = vmatpush1.bf16.msra.mxu0 %v3116_v31  ;;  %2694 = vmatpush3.bf16.msra.mxu1 %v3165_v43 }
 0x71d   :  { %v1469_v3 = vpop.f32.mrb[12].mxu0  ;;  %v1540_v21 = vpop.f32.mrb[20].mxu1 }
 0x71e   :  { %v2707_v22 = vadd.f32 %v1469_v3, %v3214_v5  ;;  %v1471_v30 = vpop.f32.mrb[13].mxu0  ;;  %v2195_v33 = vpop.f32.mrb[21].mxu1  ;;  %v1558_v60 = vadd.f32 %v3229_v38, %v1540_v21 }
 0x71f   :  { %v2708_v44 = vadd.f32 %v1471_v30, %v3223_v24 }
 0x720   :  { %v1779_v41 = vmul.f32 -1.442695, %v2707_v22 }
 0x721   :  { %v1780_v49 = vmul.f32 -1.442695, %v2708_v44 }
 0x722   :  { %2790 = vpow2.f32 %v1779_v41 }
 0x723   :  { %2792 = vpow2.f32 %v1780_v49 }
 0x72c   :  { %v2791_v51 = vpop.eup %2790 }
 0x72d   :  { %v1552_v54 = vadd.f32 1.0, %v2791_v51  ;;  %v2793_v57 = vpop.eup %2792 }
 0x72e   :  { %v1553_v9 = vadd.f32 1.0, %v2793_v57 }
 0x72f   :  { %2794 = vrcp.f32 %v1552_v54 }
 0x739   :  { %v2795_v62 = vpop.eup %2794 }
 0x73a   :  { %v1559_v1 = vmul.f32 %v2795_v62, %v1558_v60 }
 0x73c   :  { %v1560_v7 = vadd.f32 %v1559_v1, %v3221_v19 }
 0x73e   :  { %2796 = vtanh.f32 %v1560_v7 }
 0x73f   :  { %2798 = vrcp.f32 %v1553_v9 }
 0x748   :  { %v2797_v12 = vpop.eup %2796 }
 0x749   :  { %v1562_v18 = vsub.f32 %v1396_v27, %v2797_v12  ;;  %v2799_v20 = vpop.eup %2798 }
 0x74b   :  { %v1563_v25 = vmul.f32 %v2799_v20, %v1562_v18 }
 0x74d   :  { %v1564_v28 = vadd.f32 %v2797_v12, %v1563_v25 }
 0x74f   :  { %1636 = vmatmul.mubr.f32.vlgmr.msra.gmra.mrb[14].mxu0 %v1564_v28  ;;  %2229 = vmatmul.mubr.f32.vlgmr.msra.gmra.mrb[22].mxu1 %v1564_v28 }
 0x822   :  { %v1637_v31 = vpop.f32.mrb[14].mxu0  ;;  %v1708_v35 = vpop.f32.mrb[22].mxu1 }
 0x823   :  { %v2709_v39 = vadd.f32 %v1637_v31, %v3214_v5  ;;  %v1639_v43 = vpop.f32.mrb[15].mxu0  ;;  %v2230_v2 = vpop.f32.mrb[23].mxu1  ;;  %v1726_v40 = vadd.f32 %v3229_v38, %v1708_v35 }
 0x824   :  { %v2710_v19 = vadd.f32 %v1639_v43, %v3223_v24 }
 0x825   :  { %v1781_v29 = vmul.f32 -1.442695, %v2709_v39 }
 0x826   :  { %v1782_v61 = vmul.f32 -1.442695, %v2710_v19 }
 0x827   :  { %2800 = vpow2.f32 %v1781_v29 }
 0x828   :  { %2802 = vpow2.f32 %v1782_v61 }
 0x831   :  { %v2801_v32 = vpop.eup %2800 }
 0x832   :  { %v1720_v34 = vadd.f32 1.0, %v2801_v32  ;;  %v2803_v37 = vpop.eup %2802 }
 0x833   :  { %v1721_v47 = vadd.f32 1.0, %v2803_v37 }
 0x834   :  { %2804 = vrcp.f32 %v1720_v34 }
 0x83e   :  { %v2805_v42 = vpop.eup %2804 }
 0x83f   :  { %v1727_v45 = vmul.f32 %v2805_v42, %v1726_v40 }
 0x841   :  { %v1728_v46 = vadd.f32 %v1727_v45, %v3218_v11 }
 0x843   :  { %2806 = vtanh.f32 %v1728_v46 }
 0x844   :  { %2808 = vrcp.f32 %v1721_v47 }
 0x84d   :  { %v2807_v5 = vpop.eup %2806 }
 0x84e   :  { %v1730_v53 = vsub.f32 %v1564_v28, %v2807_v5  ;;  %v2809_v48 = vpop.eup %2808 }
 0x850   :  { %v1731_v6 = vmul.f32 %v2809_v48, %v1730_v53 }
 0x852   :  { %v1732_v24 = vadd.f32 %v2807_v5, %v1731_v6 }
 0x854   :  { %1738 = vst [vmem:[%s3478_s6] sm:$0xff] %v1732_v24 }

</bundles_post_ra>
